<compile_context>
chip_gen: v6e
topology: v6e:2x2x1
jax: 0.10.0
libtpu: 0.0.40
codegen_flags: <defaults>
</compile_context>

<pallas_src>
import math
from functools import partial

import jax
import jax.numpy as jnp
from jax.experimental import pallas as pl
from jax.experimental.pallas import tpu as pltpu


# --------------------------- small static helpers ---------------------------

def _round_up(x, m):
    return ((x + m - 1) // m) * m


def _pick_tpb(t_out, v_p, cap_rows):
    """Output time-steps per row tile.

    TM = tpb * v_p must be a multiple of 16 (bf16 out blocks) and should stay
    under cap_rows so the f32 accumulator stays small.  Prefers an exact
    divisor of t_out (no T padding); otherwise the caller pads T_out up to a
    multiple of the returned tile and the kernel masks padded rows out of the
    BN statistics.
    """
    assert v_p % 8 == 0
    step = 1 if v_p % 16 == 0 else 2            # keep tpb * v_p % 16 == 0
    max_t = max(1, min(t_out, max(1, cap_rows // v_p)))
    max_t = max(step, (max_t // step) * step)
    for t in range(max_t, 0, -step):
        if t_out % t == 0:
            return t
    return max_t                                 # caller pads T_out up


# ------------------------------ unit_tcn forward ------------------------------

@partial(jax.jit, static_argnames=("kernel_size", "stride"))
def unit_tcn_forward(x_nchw, weight, bias, gamma, beta,
                     kernel_size=9, stride=1, eps=1e-5):
    """x_nchw: (N, C_in, T, V) -> bn(conv(x)) with batch stats: (N, C_out, T_out, V)."""
    del bias  # exactly cancelled by training-mode BatchNorm (batch-mean subtraction)
    N, C_in, T, V = x_nchw.shape
    C_out = weight.shape[0]
    K = int(kernel_size)
    S = int(stride)
    pad = (K - 1) // 2
    T_out = (T + 2 * pad - K) // S + 1

    C_pad = _round_up(max(C_out, 128), 128)           # lane-dense rhs / out width
    V_p = _round_up(V, 8)                             # sublane-aligned row starts
    cap_rows = max(16, (128 * 1024) // (4 * C_pad))   # keep f32 acc <= 128 KiB
    tpb = _pick_tpb(T_out, V_p, cap_rows)
    T_out_p = _round_up(T_out, tpb)
    TM = tpb * V_p                                    # conv rows per grid step
    tb_per_n = T_out_p // tpb
    G = N * tb_per_n                                  # grid steps
    M_p = G * TM                                      # padded conv rows
    Q = T_out_p + (K - 1) // S                        # time-groups per stride residue
    QV = Q * V_p
    needs_mask = (T_out_p != T_out) or (V_p != V)

    # ---- layout glue: single boundary transpose, zero T/V padding, stride
    #      residue grouping so every tap reads a contiguous aligned row window:
    #      x_g[n, r, q*V_p + v, c] = x_padded[n, q*S + r, v, c]
    x_cl = jnp.transpose(x_nchw, (0, 2, 3, 1)).astype(jnp.bfloat16)   # (N,T,V,Cin)
    right = max(Q * S - (pad + T), 0)
    x_cl = jnp.pad(x_cl, ((0, 0), (pad, right), (0, V_p - V), (0, 0)))
    x_cl = x_cl[:, :Q * S]
    x_g = (x_cl.reshape(N, Q, S, V_p, C_in)
                .transpose(0, 2, 1, 3, 4)
                .reshape(N, S, QV, C_in))

    # weight (C_out, C_in, K, 1) -> (K, C_in, C_pad), zero-padded lanes, bf16
    w = jnp.transpose(weight[..., 0], (2, 1, 0))
    w = jnp.pad(w, ((0, 0), (0, 0), (0, C_pad - C_out))).astype(jnp.bfloat16)

    # ---- fused conv + BN batch-stat partials (single Pallas pass) ----
    def conv_stats_kernel(x_ref, w_ref, out_ref, sum_ref, sq_ref):
        # x_ref: (S, Q*V_p, C_in)  whole padded sample (DMAed once per n)
        # w_ref: (K, C_in, C_pad)  resident weights
        # out_ref: (TM, C_pad) bf16 conv rows; sum/sq_ref: (1, C_pad) f32 partials
        t0 = pl.program_id(1) * tpb
        acc = jnp.zeros((TM, C_pad), jnp.float32)
        for k in range(K):                            # static unroll, K MXU dots
            r, q = k % S, k // S
            start = pl.multiple_of((t0 + q) * V_p, 8)
            xs = x_ref[r, pl.ds(start, TM), :]        # (TM, C_in) bf16
            acc = acc + jnp.dot(xs, w_ref[k],
                                preferred_element_type=jnp.float32)
        if needs_mask:  # static: only traced when T_out / V were padded
            rows = jax.lax.broadcasted_iota(jnp.int32, (TM, 1), 0)
            ok = ((t0 + rows // V_p) < T_out) & ((rows % V_p) < V)
            acc = jnp.where(ok, acc, 0.0)
        out_ref[...] = acc.astype(out_ref.dtype)
        sum_ref[...] = jnp.sum(acc, axis=0, keepdims=True)
        sq_ref[...] = jnp.sum(acc * acc, axis=0, keepdims=True)

    conv_out, psum, psq = pl.pallas_call(
        conv_stats_kernel,
        out_shape=(jax.ShapeDtypeStruct((M_p, C_pad), jnp.bfloat16),
                   jax.ShapeDtypeStruct((G, 1, C_pad), jnp.float32),
                   jax.ShapeDtypeStruct((G, 1, C_pad), jnp.float32)),
        grid=(N, tb_per_n),
        in_specs=[
            pl.BlockSpec((None, S, QV, C_in), lambda n, tb: (n, 0, 0, 0)),
            pl.BlockSpec((K, C_in, C_pad), lambda n, tb: (0, 0, 0)),
        ],
        out_specs=(
            pl.BlockSpec((TM, C_pad), lambda n, tb: (n * tb_per_n + tb, 0)),
            pl.BlockSpec((None, 1, C_pad), lambda n, tb: (n * tb_per_n + tb, 0, 0)),
            pl.BlockSpec((None, 1, C_pad), lambda n, tb: (n * tb_per_n + tb, 0, 0)),
        ),
        compiler_params=pltpu.CompilerParams(
            dimension_semantics=("parallel", "arbitrary"),
            vmem_limit_bytes=32 * 1024 * 1024),
    )(x_g, w)

    # ---- tiny glue: finish BN statistics (f32, biased variance) ----
    cnt = jnp.float32(N * T_out * V)
    ssum = jnp.sum(psum[:, 0, :C_out], axis=0)
    ssq = jnp.sum(psq[:, 0, :C_out], axis=0)
    mean = ssum / cnt
    var = jnp.maximum(ssq / cnt - mean * mean, 0.0)
    inv = jax.lax.rsqrt(var + eps)
    scale = gamma.astype(jnp.float32) * inv
    shift = beta.astype(jnp.float32) - mean * scale

    # BN affine + channel/row slice + NCHW transpose: left to XLA, which fuses
    # them into one read of the bf16 conv rows and one f32 write of the output.
    y = conv_out.reshape(N, T_out_p, V_p, C_pad)[:, :T_out, :V, :C_out]
    y = y.astype(jnp.float32) * scale + shift
    return jnp.transpose(y, (0, 3, 1, 2))


# ------------------------------ pure-JAX reference ----------------------------

def _reference(x, weight, bias, gamma, beta, kernel_size, stride, eps=1e-5):
    pad = (kernel_size - 1) // 2
    y = jax.lax.conv_general_dilated(
        x, weight, window_strides=(stride, 1),
        padding=((pad, pad), (0, 0)),
        dimension_numbers=("NCHW", "OIHW", "NCHW"))
    y = y + bias.reshape(1, -1, 1, 1)
    mean = jnp.mean(y, axis=(0, 2, 3), keepdims=True)
    var = jnp.mean((y - mean) ** 2, axis=(0, 2, 3), keepdims=True)
    y = (y - mean) * jax.lax.rsqrt(var + eps)
    return y * gamma.reshape(1, -1, 1, 1) + beta.reshape(1, -1, 1, 1)


# ---------------------------------- main --------------------------------------

if __name__ == "__main__":
    N, C_in, C_out, T, V = 2, 4, 8, 16, 16
    K, stride = 9, 1

    key = jax.random.PRNGKey(0)
    kx, kw = jax.random.split(key)
    x = jax.random.normal(kx, (N, C_in, T, V), dtype=jnp.float32)

    # conv_init: kaiming_normal_(mode='fan_out') -> std = sqrt(2 / (C_out*K*1)),
    # bias = 0.  bn_init(bn, 1): gamma = 1, beta = 0.
    fan_out = C_out * K * 1
    weight = (jax.random.normal(kw, (C_out, C_in, K, 1), dtype=jnp.float32)
              * math.sqrt(2.0 / fan_out))
    bias = jnp.zeros((C_out,), jnp.float32)
    gamma = jnp.ones((C_out,), jnp.float32)
    beta = jnp.zeros((C_out,), jnp.float32)

    out = unit_tcn_forward(x, weight, bias, gamma, beta,
                           kernel_size=K, stride=stride)
    out = jax.block_until_ready(out)

    assert out.shape == (N, C_out, T, V), out.shape
    assert bool(jnp.all(jnp.isfinite(out)))

    ref = _reference(x, weight, bias, gamma, beta, K, stride)
    err = float(jnp.max(jnp.abs(out - ref)))
    assert err < 5e-2, f"max |err| vs reference = {err}"
    print("KERNEL_OK")
</pallas_src>

<mosaic_0001>
module attributes {stable_mosaic.version = 11 : i64} {
  func.func @conv_stats_kernel(%arg0: i32, %arg1: i32, %arg2: memref<1x1x384x4xbf16, #tpu.memory_space<vmem>>, %arg3: memref<9x4x128xbf16, #tpu.memory_space<vmem>>, %arg4: memref<256x128xbf16, #tpu.memory_space<vmem>>, %arg5: memref<1x1x128xf32, #tpu.memory_space<vmem>>, %arg6: memref<1x1x128xf32, #tpu.memory_space<vmem>>) attributes {dimension_semantics = [#tpu.dimension_semantics<parallel>, #tpu.dimension_semantics<arbitrary>], iteration_bounds = array<i64: 2, 1>, scalar_prefetch = 0 : i64, scratch_operands = 0 : i64, tpu.core_type = #tpu.core_type<tc>, window_params = [{transform_indices = @transform_0, window_bounds = array<i64: 1, 1, 384, 4>}, {pipeline_mode = #tpu.pipeline_mode<synchronous>, transform_indices = @transform_1, window_bounds = array<i64: 9, 4, 128>}, {transform_indices = @transform_2, window_bounds = array<i64: 256, 128>}, {transform_indices = @transform_3, window_bounds = array<i64: 1, 1, 128>}, {transform_indices = @transform_4, window_bounds = array<i64: 1, 1, 128>}]} {
    %c16_i32 = arith.constant 16 : i32
    %0 = arith.muli %arg1, %c16_i32 : i32
    %cst = arith.constant 0.000000e+00 : f32
    %1 = vector.broadcast %cst : f32 to vector<256x128xf32>
    %c0_i32 = arith.constant 0 : i32
    %2 = arith.addi %0, %c0_i32 : i32
    %c16_i32_0 = arith.constant 16 : i32
    %3 = arith.muli %2, %c16_i32_0 : i32
    %4 = tpu.assume_multiple %3, 8 : i32
    %c0 = arith.constant 0 : index
    %c0_1 = arith.constant 0 : index
    %5 = arith.index_cast %4 : i32 to index
    %c0_2 = arith.constant 0 : index
    %6 = vector.load %arg2[%c0, %c0_1, %5, %c0_2] : memref<1x1x384x4xbf16, #tpu.memory_space<vmem>>, vector<1x1x256x4xbf16>
    %7 = vector.shape_cast %6 : vector<1x1x256x4xbf16> to vector<256x4xbf16>
    %c0_3 = arith.constant 0 : index
    %c0_4 = arith.constant 0 : index
    %c0_5 = arith.constant 0 : index
    %8 = vector.load %arg3[%c0_3, %c0_4, %c0_5] : memref<9x4x128xbf16, #tpu.memory_space<vmem>>, vector<1x4x128xbf16>
    %9 = vector.shape_cast %8 : vector<1x4x128xbf16> to vector<4x128xbf16>
    %cst_6 = arith.constant dense<0.000000e+00> : vector<256x128xf32>
    %10 = tpu.matmul %7, %9, %cst_6 {dimension_numbers = #tpu.dot_dimension_numbers<[1], [0], [0], [1], [0, 0, 1, 1], [], []>} : vector<256x4xbf16>, vector<4x128xbf16>, vector<256x128xf32> -> vector<256x128xf32>
    %11 = arith.addf %1, %10 : vector<256x128xf32>
    %c1_i32 = arith.constant 1 : i32
    %12 = arith.addi %0, %c1_i32 : i32
    %c16_i32_7 = arith.constant 16 : i32
    %13 = arith.muli %12, %c16_i32_7 : i32
    %14 = tpu.assume_multiple %13, 8 : i32
    %c0_8 = arith.constant 0 : index
    %c0_9 = arith.constant 0 : index
    %15 = arith.index_cast %14 : i32 to index
    %c0_10 = arith.constant 0 : index
    %16 = vector.load %arg2[%c0_8, %c0_9, %15, %c0_10] : memref<1x1x384x4xbf16, #tpu.memory_space<vmem>>, vector<1x1x256x4xbf16>
    %17 = vector.shape_cast %16 : vector<1x1x256x4xbf16> to vector<256x4xbf16>
    %c1 = arith.constant 1 : index
    %c0_11 = arith.constant 0 : index
    %c0_12 = arith.constant 0 : index
    %18 = vector.load %arg3[%c1, %c0_11, %c0_12] : memref<9x4x128xbf16, #tpu.memory_space<vmem>>, vector<1x4x128xbf16>
    %19 = vector.shape_cast %18 : vector<1x4x128xbf16> to vector<4x128xbf16>
    %cst_13 = arith.constant dense<0.000000e+00> : vector<256x128xf32>
    %20 = tpu.matmul %17, %19, %cst_13 {dimension_numbers = #tpu.dot_dimension_numbers<[1], [0], [0], [1], [0, 0, 1, 1], [], []>} : vector<256x4xbf16>, vector<4x128xbf16>, vector<256x128xf32> -> vector<256x128xf32>
    %21 = arith.addf %11, %20 : vector<256x128xf32>
    %c2_i32 = arith.constant 2 : i32
    %22 = arith.addi %0, %c2_i32 : i32
    %c16_i32_14 = arith.constant 16 : i32
    %23 = arith.muli %22, %c16_i32_14 : i32
    %24 = tpu.assume_multiple %23, 8 : i32
    %c0_15 = arith.constant 0 : index
    %c0_16 = arith.constant 0 : index
    %25 = arith.index_cast %24 : i32 to index
    %c0_17 = arith.constant 0 : index
    %26 = vector.load %arg2[%c0_15, %c0_16, %25, %c0_17] : memref<1x1x384x4xbf16, #tpu.memory_space<vmem>>, vector<1x1x256x4xbf16>
    %27 = vector.shape_cast %26 : vector<1x1x256x4xbf16> to vector<256x4xbf16>
    %c2 = arith.constant 2 : index
    %c0_18 = arith.constant 0 : index
    %c0_19 = arith.constant 0 : index
    %28 = vector.load %arg3[%c2, %c0_18, %c0_19] : memref<9x4x128xbf16, #tpu.memory_space<vmem>>, vector<1x4x128xbf16>
    %29 = vector.shape_cast %28 : vector<1x4x128xbf16> to vector<4x128xbf16>
    %cst_20 = arith.constant dense<0.000000e+00> : vector<256x128xf32>
    %30 = tpu.matmul %27, %29, %cst_20 {dimension_numbers = #tpu.dot_dimension_numbers<[1], [0], [0], [1], [0, 0, 1, 1], [], []>} : vector<256x4xbf16>, vector<4x128xbf16>, vector<256x128xf32> -> vector<256x128xf32>
    %31 = arith.addf %21, %30 : vector<256x128xf32>
    %c3_i32 = arith.constant 3 : i32
    %32 = arith.addi %0, %c3_i32 : i32
    %c16_i32_21 = arith.constant 16 : i32
    %33 = arith.muli %32, %c16_i32_21 : i32
    %34 = tpu.assume_multiple %33, 8 : i32
    %c0_22 = arith.constant 0 : index
    %c0_23 = arith.constant 0 : index
    %35 = arith.index_cast %34 : i32 to index
    %c0_24 = arith.constant 0 : index
    %36 = vector.load %arg2[%c0_22, %c0_23, %35, %c0_24] : memref<1x1x384x4xbf16, #tpu.memory_space<vmem>>, vector<1x1x256x4xbf16>
    %37 = vector.shape_cast %36 : vector<1x1x256x4xbf16> to vector<256x4xbf16>
    %c3 = arith.constant 3 : index
    %c0_25 = arith.constant 0 : index
    %c0_26 = arith.constant 0 : index
    %38 = vector.load %arg3[%c3, %c0_25, %c0_26] : memref<9x4x128xbf16, #tpu.memory_space<vmem>>, vector<1x4x128xbf16>
    %39 = vector.shape_cast %38 : vector<1x4x128xbf16> to vector<4x128xbf16>
    %cst_27 = arith.constant dense<0.000000e+00> : vector<256x128xf32>
    %40 = tpu.matmul %37, %39, %cst_27 {dimension_numbers = #tpu.dot_dimension_numbers<[1], [0], [0], [1], [0, 0, 1, 1], [], []>} : vector<256x4xbf16>, vector<4x128xbf16>, vector<256x128xf32> -> vector<256x128xf32>
    %41 = arith.addf %31, %40 : vector<256x128xf32>
    %c4_i32 = arith.constant 4 : i32
    %42 = arith.addi %0, %c4_i32 : i32
    %c16_i32_28 = arith.constant 16 : i32
    %43 = arith.muli %42, %c16_i32_28 : i32
    %44 = tpu.assume_multiple %43, 8 : i32
    %c0_29 = arith.constant 0 : index
    %c0_30 = arith.constant 0 : index
    %45 = arith.index_cast %44 : i32 to index
    %c0_31 = arith.constant 0 : index
    %46 = vector.load %arg2[%c0_29, %c0_30, %45, %c0_31] : memref<1x1x384x4xbf16, #tpu.memory_space<vmem>>, vector<1x1x256x4xbf16>
    %47 = vector.shape_cast %46 : vector<1x1x256x4xbf16> to vector<256x4xbf16>
    %c4 = arith.constant 4 : index
    %c0_32 = arith.constant 0 : index
    %c0_33 = arith.constant 0 : index
    %48 = vector.load %arg3[%c4, %c0_32, %c0_33] : memref<9x4x128xbf16, #tpu.memory_space<vmem>>, vector<1x4x128xbf16>
    %49 = vector.shape_cast %48 : vector<1x4x128xbf16> to vector<4x128xbf16>
    %cst_34 = arith.constant dense<0.000000e+00> : vector<256x128xf32>
    %50 = tpu.matmul %47, %49, %cst_34 {dimension_numbers = #tpu.dot_dimension_numbers<[1], [0], [0], [1], [0, 0, 1, 1], [], []>} : vector<256x4xbf16>, vector<4x128xbf16>, vector<256x128xf32> -> vector<256x128xf32>
    %51 = arith.addf %41, %50 : vector<256x128xf32>
    %c5_i32 = arith.constant 5 : i32
    %52 = arith.addi %0, %c5_i32 : i32
    %c16_i32_35 = arith.constant 16 : i32
    %53 = arith.muli %52, %c16_i32_35 : i32
    %54 = tpu.assume_multiple %53, 8 : i32
    %c0_36 = arith.constant 0 : index
    %c0_37 = arith.constant 0 : index
    %55 = arith.index_cast %54 : i32 to index
    %c0_38 = arith.constant 0 : index
    %56 = vector.load %arg2[%c0_36, %c0_37, %55, %c0_38] : memref<1x1x384x4xbf16, #tpu.memory_space<vmem>>, vector<1x1x256x4xbf16>
    %57 = vector.shape_cast %56 : vector<1x1x256x4xbf16> to vector<256x4xbf16>
    %c5 = arith.constant 5 : index
    %c0_39 = arith.constant 0 : index
    %c0_40 = arith.constant 0 : index
    %58 = vector.load %arg3[%c5, %c0_39, %c0_40] : memref<9x4x128xbf16, #tpu.memory_space<vmem>>, vector<1x4x128xbf16>
    %59 = vector.shape_cast %58 : vector<1x4x128xbf16> to vector<4x128xbf16>
    %cst_41 = arith.constant dense<0.000000e+00> : vector<256x128xf32>
    %60 = tpu.matmul %57, %59, %cst_41 {dimension_numbers = #tpu.dot_dimension_numbers<[1], [0], [0], [1], [0, 0, 1, 1], [], []>} : vector<256x4xbf16>, vector<4x128xbf16>, vector<256x128xf32> -> vector<256x128xf32>
    %61 = arith.addf %51, %60 : vector<256x128xf32>
    %c6_i32 = arith.constant 6 : i32
    %62 = arith.addi %0, %c6_i32 : i32
    %c16_i32_42 = arith.constant 16 : i32
    %63 = arith.muli %62, %c16_i32_42 : i32
    %64 = tpu.assume_multiple %63, 8 : i32
    %c0_43 = arith.constant 0 : index
    %c0_44 = arith.constant 0 : index
    %65 = arith.index_cast %64 : i32 to index
    %c0_45 = arith.constant 0 : index
    %66 = vector.load %arg2[%c0_43, %c0_44, %65, %c0_45] : memref<1x1x384x4xbf16, #tpu.memory_space<vmem>>, vector<1x1x256x4xbf16>
    %67 = vector.shape_cast %66 : vector<1x1x256x4xbf16> to vector<256x4xbf16>
    %c6 = arith.constant 6 : index
    %c0_46 = arith.constant 0 : index
    %c0_47 = arith.constant 0 : index
    %68 = vector.load %arg3[%c6, %c0_46, %c0_47] : memref<9x4x128xbf16, #tpu.memory_space<vmem>>, vector<1x4x128xbf16>
    %69 = vector.shape_cast %68 : vector<1x4x128xbf16> to vector<4x128xbf16>
    %cst_48 = arith.constant dense<0.000000e+00> : vector<256x128xf32>
    %70 = tpu.matmul %67, %69, %cst_48 {dimension_numbers = #tpu.dot_dimension_numbers<[1], [0], [0], [1], [0, 0, 1, 1], [], []>} : vector<256x4xbf16>, vector<4x128xbf16>, vector<256x128xf32> -> vector<256x128xf32>
    %71 = arith.addf %61, %70 : vector<256x128xf32>
    %c7_i32 = arith.constant 7 : i32
    %72 = arith.addi %0, %c7_i32 : i32
    %c16_i32_49 = arith.constant 16 : i32
    %73 = arith.muli %72, %c16_i32_49 : i32
    %74 = tpu.assume_multiple %73, 8 : i32
    %c0_50 = arith.constant 0 : index
    %c0_51 = arith.constant 0 : index
    %75 = arith.index_cast %74 : i32 to index
    %c0_52 = arith.constant 0 : index
    %76 = vector.load %arg2[%c0_50, %c0_51, %75, %c0_52] : memref<1x1x384x4xbf16, #tpu.memory_space<vmem>>, vector<1x1x256x4xbf16>
    %77 = vector.shape_cast %76 : vector<1x1x256x4xbf16> to vector<256x4xbf16>
    %c7 = arith.constant 7 : index
    %c0_53 = arith.constant 0 : index
    %c0_54 = arith.constant 0 : index
    %78 = vector.load %arg3[%c7, %c0_53, %c0_54] : memref<9x4x128xbf16, #tpu.memory_space<vmem>>, vector<1x4x128xbf16>
    %79 = vector.shape_cast %78 : vector<1x4x128xbf16> to vector<4x128xbf16>
    %cst_55 = arith.constant dense<0.000000e+00> : vector<256x128xf32>
    %80 = tpu.matmul %77, %79, %cst_55 {dimension_numbers = #tpu.dot_dimension_numbers<[1], [0], [0], [1], [0, 0, 1, 1], [], []>} : vector<256x4xbf16>, vector<4x128xbf16>, vector<256x128xf32> -> vector<256x128xf32>
    %81 = arith.addf %71, %80 : vector<256x128xf32>
    %c8_i32 = arith.constant 8 : i32
    %82 = arith.addi %0, %c8_i32 : i32
    %c16_i32_56 = arith.constant 16 : i32
    %83 = arith.muli %82, %c16_i32_56 : i32
    %84 = tpu.assume_multiple %83, 8 : i32
    %c0_57 = arith.constant 0 : index
    %c0_58 = arith.constant 0 : index
    %85 = arith.index_cast %84 : i32 to index
    %c0_59 = arith.constant 0 : index
    %86 = vector.load %arg2[%c0_57, %c0_58, %85, %c0_59] : memref<1x1x384x4xbf16, #tpu.memory_space<vmem>>, vector<1x1x256x4xbf16>
    %87 = vector.shape_cast %86 : vector<1x1x256x4xbf16> to vector<256x4xbf16>
    %c8 = arith.constant 8 : index
    %c0_60 = arith.constant 0 : index
    %c0_61 = arith.constant 0 : index
    %88 = vector.load %arg3[%c8, %c0_60, %c0_61] : memref<9x4x128xbf16, #tpu.memory_space<vmem>>, vector<1x4x128xbf16>
    %89 = vector.shape_cast %88 : vector<1x4x128xbf16> to vector<4x128xbf16>
    %cst_62 = arith.constant dense<0.000000e+00> : vector<256x128xf32>
    %90 = tpu.matmul %87, %89, %cst_62 {dimension_numbers = #tpu.dot_dimension_numbers<[1], [0], [0], [1], [0, 0, 1, 1], [], []>} : vector<256x4xbf16>, vector<4x128xbf16>, vector<256x128xf32> -> vector<256x128xf32>
    %91 = arith.addf %81, %90 : vector<256x128xf32>
    %92 = arith.truncf %91 : vector<256x128xf32> to vector<256x128xbf16>
    %c0_63 = arith.constant 0 : index
    %c0_64 = arith.constant 0 : index
    %93 = vector.load %arg4[%c0_63, %c0_64] : memref<256x128xbf16, #tpu.memory_space<vmem>>, vector<256x128xbf16>
    tpu.vector_store %arg4[%c0_63, %c0_64], %92 {strides = array<i32>} : memref<256x128xbf16, #tpu.memory_space<vmem>>, vector<256x128xbf16>,
    %cst_65 = arith.constant dense<0.000000e+00> : vector<128xf32>
    %94 = vector.multi_reduction <add>, %91, %cst_65 [0] : vector<256x128xf32> to vector<128xf32>
    %95 = vector.shape_cast %94 : vector<128xf32> to vector<1x128xf32>
    %c0_66 = arith.constant 0 : index
    %c0_67 = arith.constant 0 : index
    %c0_68 = arith.constant 0 : index
    %96 = vector.load %arg5[%c0_66, %c0_67, %c0_68] : memref<1x1x128xf32, #tpu.memory_space<vmem>>, vector<1x1x128xf32>
    %97 = vector.shape_cast %96 : vector<1x1x128xf32> to vector<1x128xf32>
    %98 = vector.shape_cast %95 : vector<1x128xf32> to vector<1x1x128xf32>
    tpu.vector_store %arg5[%c0_66, %c0_67, %c0_68], %98 {strides = array<i32>} : memref<1x1x128xf32, #tpu.memory_space<vmem>>, vector<1x1x128xf32>,
    %99 = arith.mulf %91, %91 : vector<256x128xf32>
    %cst_69 = arith.constant dense<0.000000e+00> : vector<128xf32>
    %100 = vector.multi_reduction <add>, %99, %cst_69 [0] : vector<256x128xf32> to vector<128xf32>
    %101 = vector.shape_cast %100 : vector<128xf32> to vector<1x128xf32>
    %c0_70 = arith.constant 0 : index
    %c0_71 = arith.constant 0 : index
    %c0_72 = arith.constant 0 : index
    %102 = vector.load %arg6[%c0_70, %c0_71, %c0_72] : memref<1x1x128xf32, #tpu.memory_space<vmem>>, vector<1x1x128xf32>
    %103 = vector.shape_cast %102 : vector<1x1x128xf32> to vector<1x128xf32>
    %104 = vector.shape_cast %101 : vector<1x128xf32> to vector<1x1x128xf32>
    tpu.vector_store %arg6[%c0_70, %c0_71, %c0_72], %104 {strides = array<i32>} : memref<1x1x128xf32, #tpu.memory_space<vmem>>, vector<1x1x128xf32>,
    return
  }
  func.func @transform_0(%arg0: i32, %arg1: i32) -> (i32, i32, i32, i32) {
    %c0_i32 = arith.constant 0 : i32
    %c0_i32_0 = arith.constant 0 : i32
    %c0_i32_1 = arith.constant 0 : i32
    %c0_i32_2 = arith.constant 0 : i32
    return %arg0, %c0_i32, %c0_i32_0, %c0_i32_1 : i32, i32, i32, i32
  }
  func.func @transform_1(%arg0: i32, %arg1: i32) -> (i32, i32, i32) {
    %c0_i32 = arith.constant 0 : i32
    %c0_i32_0 = arith.constant 0 : i32
    %c0_i32_1 = arith.constant 0 : i32
    %c0_i32_2 = arith.constant 0 : i32
    return %c0_i32, %c0_i32_0, %c0_i32_1 : i32, i32, i32
  }
  func.func @transform_2(%arg0: i32, %arg1: i32) -> (i32, i32) {
    %c1_i32 = arith.constant 1 : i32
    %0 = arith.muli %arg0, %c1_i32 : i32
    %1 = arith.addi %0, %arg1 : i32
    %c0_i32 = arith.constant 0 : i32
    %c0_i32_0 = arith.constant 0 : i32
    return %1, %c0_i32 : i32, i32
  }
  func.func @transform_3(%arg0: i32, %arg1: i32) -> (i32, i32, i32) {
    %c1_i32 = arith.constant 1 : i32
    %0 = arith.muli %arg0, %c1_i32 : i32
    %1 = arith.addi %0, %arg1 : i32
    %c0_i32 = arith.constant 0 : i32
    %c0_i32_0 = arith.constant 0 : i32
    %c0_i32_1 = arith.constant 0 : i32
    return %1, %c0_i32, %c0_i32_0 : i32, i32, i32
  }
  func.func @transform_4(%arg0: i32, %arg1: i32) -> (i32, i32, i32) {
    %c1_i32 = arith.constant 1 : i32
    %0 = arith.muli %arg0, %c1_i32 : i32
    %1 = arith.addi %0, %arg1 : i32
    %c0_i32 = arith.constant 0 : i32
    %c0_i32_0 = arith.constant 0 : i32
    %c0_i32_1 = arith.constant 0 : i32
    return %1, %c0_i32, %c0_i32_0 : i32, i32, i32
  }
}

</mosaic_0001>

<bundles_post_ra>
// kernel: unit_tcn_forward.1
= control target key start
LH: loop header
LB: loop body
LE: loop exit
PB: predicated region body
PF: predicated region fallthrough
CT: control target
= control target key end

     0   :  { %s5277_s15 = smov 0   ;;  %s5279_s16 = smov 0   ;;  %s6149_s0 = inlined_call_operand.vmem [shape: bf16[2,1,384,4], index: 0, kind: input, shape index: {}]   ;;  %s6150_s1 = inlined_call_operand.vmem [shape: bf16[9,4,128], index: 1, kind: input, shape index: {}]   ;;  %s6151_s2 = inlined_call_operand.vmem [shape: bf16[512,128], index: 2, kind: output, shape index: {0}]   ;;  %s6152_s3 = inlined_call_operand.vmem [shape: f32[2,1,128], index: 3, kind: output, shape index: {1}]   ;;  %s6153_s4 = inlined_call_operand.vmem [shape: f32[2,1,128], index: 4, kind: output, shape index: {2}]  }
   0x1   :  { %s5281_s17 = smov 0  }
   0x2 LB: > { %s27_s18 = sadd.s32 1, %s5246_s16  ;;  %p3871_p0 = scmp.ge.s32.totalorder %s5250_s17, 1  ;;  %s5250_s17 = sphi %s5281_s17, %s15_s17   ;;  %s5246_s16 = sphi %s5279_s16, %s6211_s16   ;;  %s5242_s15 = sphi %s5277_s15, %s6210_s15  }
   0x3   : > { %p29_p1 = scmp.ge.s32.totalorder %s27_s18, 2  ;;  %p185_p2 = scmp.lt.s32.totalorder %s5250_s17, 3 }
   0x5   : > { %s6213_s18 = smov (%p29_p1, %s27_s18), 0  ;;  %p186_p3 = pnand %p3871_p0, %p185_p2 }
   0x7   : > { %189 = sbr.rel (%p186_p3) target bundleno = 527 (0x20f), region = 28 }
   0xc   : > { %v3907_v0 = vld [vmem:[%s6150_s1 + $0x2] sm:$0x3]  ;;  %vm452_vm0 = vcmask 1041408   ;;  %p220_p4 = scmp.lt.s32.totalorder %s5242_s15, 1  ;;  %v282_v2 = vld [vmem:[%s6150_s1] sm:$0x3] }
   0xd   : > { %5050 = vmatprep.subr.msk.bf16.mxu1 %vm452_vm0, %v3907_v0  ;;  %5049 = vmatprep.subr.msk.bf16.mxu0 %vm452_vm0, %v3907_v0  ;;  %v454_v1 = vsel %vm452_vm0, %v3907_v0, 0  ;;  %v4004_v3 = vld [vmem:[%s6150_s1 + $0x4] sm:$0x3]  ;;  %vm403_vm1 = vcmask 31744   ;;  %v4069_v8 = vld [vmem:[%s6150_s1 + $0x6] sm:$0x3] }
   0xe   : > { %5048 = vmatpush3.bf16.msra.mxu1 %v454_v1  ;;  %4742 = vmatpush3.bf16.msra.mxu0 %v454_v1  ;;  %s5311_s25 = scalar_select %p220_p4, %s5242_s15, 1  ;;  %v1078_v7 = vsel %vm452_vm0, %v4004_v3, 0  ;;  %v746_v10 = vsel %vm452_vm0, %v282_v2, 0  ;;  %v4134_v11 = vld [vmem:[%s6150_s1 + $0x8] sm:$0x3]  ;;  %v1442_v30 = vsel %vm452_vm0, %v4069_v8, 0 }
   0xf   : > { %5051 = vmatprep.subr.msk.bf16.mxu1 %vm452_vm0, %v282_v2  ;;  %5052 = vmatprep.subr.msk.bf16.mxu0 %vm452_vm0, %v4004_v3  ;;  %v1806_v28 = vsel %vm452_vm0, %v4134_v11, 0  ;;  %v5377_v32 = vld [vmem:[%s6150_s1 + $0xa] sm:$0x3]  ;;  %v5383_v33 = vld [vmem:[%s6150_s1 + $0xc] sm:$0x3]  ;;  %s3873_s20 = sshll.u32 %s5242_s15, 5 }
  0x10   : > { %s5059_s26 = smul.u32 192, %s5311_s25  ;;  %v2534_v0 = vsel %vm452_vm0, %v5383_v33, 0  ;;  %v2170_v2 = vsel %vm452_vm0, %v5377_v32, 0  ;;  %p227_p5 = scmp.lt.s32.totalorder %s3873_s20, 63 }
  0x11   : > { %s236_s27 = scalar_lea.vmem %s6152_s3, %s5311_s25  ;;  %s241_s30 = scalar_lea.vmem %s6153_s4, %s5311_s25 }
  0x12   : > { %s5319_s29 = scalar_lea.vmem %s6149_s0, %s5059_s26  ;;  %s6215_s20 = smov (!%p227_p5, %s3873_s20), 63 }
  0x13   : > { %v5084_v4 = vld [vmem:[%s5319_s29 + $0x8] sm:$0xff]   ;;  %v5086_v6 = vld [vmem:[%s5319_s29 + $0x10] sm:$0xff]   ;;  %v5088_v12 = vld [vmem:[%s5319_s29 + $0x18] sm:$0xff]   ;;  %s3874_s15 = sshll.u32 %s6215_s20, 2 }
  0x14   : > { %v5085_v5 = vld [vmem:[%s5319_s29 + $0x48] sm:$0xff]   ;;  %4743 = vmatprep.mubr.msk.bf16.mxu0 %vm403_vm1, %v5084_v4  ;;  %v5087_v9 = vld [vmem:[%s5319_s29 + $0x50] sm:$0xff]   ;;  %v5089_v13 = vld [vmem:[%s5319_s29 + $0x58] sm:$0xff]   ;;  %s6050_s23 = scalar_lea.vmem %s6151_s2, %s3874_s15 }
  0x15   : > { %4759 = vmatprep.mubr.msk.bf16.mxu1 %vm403_vm1, %v5085_v5  ;;  %4744 = vmatmul.mubr.msk.bf16.vlgmr.msra.gmra.mxu0 %vm403_vm1, %v5086_v6  ;;  %v5090_v14 = vld [vmem:[%s5319_s29 + $0x20] sm:$0xff]   ;;  %v5092_v16 = vld [vmem:[%s5319_s29 + $0x28] sm:$0xff]   ;;  %v5094_v18 = vld [vmem:[%s5319_s29 + $0x30] sm:$0xff]  }
  0x16   : > { %4760 = vmatmul.mubr.msk.bf16.vlgmr.msra.gmra.mxu1 %vm403_vm1, %v5087_v9  ;;  %4810 = vmatpush3.bf16.msra.mxu0 %v1078_v7  ;;  %v5091_v15 = vld [vmem:[%s5319_s29 + $0x60] sm:$0xff]   ;;  %v5093_v17 = vld [vmem:[%s5319_s29 + $0x68] sm:$0xff]   ;;  %v5095_v19 = vld [vmem:[%s5319_s29 + $0x70] sm:$0xff]  }
  0x17   : > { %4776 = vmatpush3.bf16.msra.mxu1 %v746_v10  ;;  %4747 = vmatprep.mubr.msk.bf16.mxu0 %vm403_vm1, %v5088_v12  ;;  %v5096_v20 = vld [vmem:[%s5319_s29 + $0x38] sm:$0xff]   ;;  %v5098_v22 = vld [vmem:[%s5319_s29 + $0x40] sm:$0xff]   ;;  %v5101_v24 = vld [vmem:[%s5319_s29 + $0x10] sm:$0xff]  }
  0x18   : > { %4763 = vmatprep.mubr.msk.bf16.mxu1 %vm403_vm1, %v5089_v13  ;;  %5053 = vmatprep.subr.msk.bf16.mxu1 %vm452_vm0, %v4069_v8  ;;  %v5097_v21 = vld [vmem:[%s5319_s29 + $0x78] sm:$0xff]   ;;  %v5099_v23 = vld [vmem:[%s5319_s29 + $0x80] sm:$0xff]   ;;  %v5102_v27 = vld [vmem:[%s5319_s29 + $0x8] sm:$0xff]  }
  0x19   : > { %5054 = vmatprep.subr.msk.bf16.mxu0 %vm452_vm0, %v4134_v11  ;;  %v5100_v25 = vld [vmem:[%s5319_s29] sm:$0xff]   ;;  %v5103_v26 = vld [vmem:[%s5319_s29 + $0x18] sm:$0xff]   ;;  %v5104_v29 = vld [vmem:[%s5319_s29 + $0x10] sm:$0xff]  }
  0x1a   : > { %v5105_v31 = vld [vmem:[%s5319_s29 + $0x20] sm:$0xff]   ;;  %v5106_v34 = vld [vmem:[%s5319_s29 + $0x18] sm:$0xff]   ;;  %v5107_v35 = vld [vmem:[%s5319_s29 + $0x28] sm:$0xff]  }
  0x1b   : > { %v5109_v36 = vld [vmem:[%s5319_s29 + $0x30] sm:$0xff]   ;;  %v5108_v37 = vld [vmem:[%s5319_s29 + $0x20] sm:$0xff]   ;;  %v5110_v38 = vld [vmem:[%s5319_s29 + $0x28] sm:$0xff]  }
  0x1c   : > { %v5111_v39 = vld [vmem:[%s5319_s29 + $0x38] sm:$0xff]   ;;  %v5113_v40 = vld [vmem:[%s5319_s29 + $0x40] sm:$0xff]   ;;  %v5112_v41 = vld [vmem:[%s5319_s29 + $0x30] sm:$0xff]  }
  0x1d   : > { %4748 = vmatmul.mubr.msk.bf16.gmra.mxu0 %vm403_vm1, %v5090_v14  ;;  %v5114_v42 = vld [vmem:[%s5319_s29 + $0x38] sm:$0xff]   ;;  %v5115_v43 = vld [vmem:[%s5319_s29 + $0x48] sm:$0xff]   ;;  %v5117_v44 = vld [vmem:[%s5319_s29 + $0x50] sm:$0xff]  }
  0x1e   : > { %4764 = vmatmul.mubr.msk.bf16.gmra.mxu1 %vm403_vm1, %v5091_v15  ;;  %4751 = vmatprep.mubr.msk.bf16.mxu0 %vm403_vm1, %v5092_v16  ;;  %v5116_v45 = vld [vmem:[%s5319_s29 + $0x40] sm:$0xff]   ;;  %v5118_v46 = vld [vmem:[%s5319_s29 + $0x48] sm:$0xff]   ;;  %v5119_v47 = vld [vmem:[%s5319_s29 + $0x58] sm:$0xff]  }
  0x1f   : > { %4767 = vmatprep.mubr.msk.bf16.mxu1 %vm403_vm1, %v5093_v17  ;;  %v5121_v48 = vld [vmem:[%s5319_s29 + $0x60] sm:$0xff]   ;;  %v5120_v49 = vld [vmem:[%s5319_s29 + $0x50] sm:$0xff]   ;;  %v5122_v50 = vld [vmem:[%s5319_s29 + $0x58] sm:$0xff]  }
  0x20   : > { %v5123_v51 = vld [vmem:[%s5319_s29 + $0x68] sm:$0xff]   ;;  %v5125_v52 = vld [vmem:[%s5319_s29 + $0x70] sm:$0xff]   ;;  %v5124_v53 = vld [vmem:[%s5319_s29 + $0x60] sm:$0xff]  }
  0x21   : > { %v5126_v54 = vld [vmem:[%s5319_s29 + $0x68] sm:$0xff]   ;;  %v5127_v55 = vld [vmem:[%s5319_s29 + $0x78] sm:$0xff]   ;;  %v5129_v56 = vld [vmem:[%s5319_s29 + $0x80] sm:$0xff]  }
  0x22   : > { %v5128_v57 = vld [vmem:[%s5319_s29 + $0x70] sm:$0xff]   ;;  %v5130_v58 = vld [vmem:[%s5319_s29 + $0x78] sm:$0xff]   ;;  %v5131_v59 = vld [vmem:[%s5319_s29 + $0x88] sm:$0xff]  }
  0x23   : > { %v5133_v60 = vld [vmem:[%s5319_s29 + $0x20] sm:$0xff]   ;;  %v5132_v61 = vld [vmem:[%s5319_s29 + $0x18] sm:$0xff]   ;;  %v5135_v62 = vld [vmem:[%s5319_s29 + $0x28] sm:$0xff]  }
  0x24   : > { %v5134_v63 = vld [vmem:[%s5319_s29 + $0x20] sm:$0xff]   ;;  %v5136_v1 = vld [vmem:[%s5319_s29 + $0x28] sm:$0xff]   ;;  %v5137_v3 = vld [vmem:[%s5319_s29 + $0x30] sm:$0xff]  }
  0x25   : > { %4752 = vmatmul.mubr.msk.bf16.gmra.mxu0 %vm403_vm1, %v5094_v18  ;;  %v5459_v4 = vld [vmem:[%s6150_s1 + $0xe] sm:$0x3]  ;;  %v5465_v5 = vld [vmem:[%s6150_s1 + $0x10] sm:$0x3]  ;;  %v5139_v7 = vld [vmem:[%s5319_s29 + $0x38] sm:$0xff]  }
  0x26   : > { %4768 = vmatmul.mubr.msk.bf16.gmra.mxu1 %vm403_vm1, %v5095_v19  ;;  %4755 = vmatprep.mubr.msk.bf16.mxu0 %vm403_vm1, %v5096_v20  ;;  %v5138_v6 = vld [vmem:[%s5319_s29 + $0x30] sm:$0xff]   ;;  %v5141_v8 = vld [vmem:[%s5319_s29 + $0x40] sm:$0xff]   ;;  %v5140_v9 = vld [vmem:[%s5319_s29 + $0x38] sm:$0xff]  }
  0x27   : > { %4771 = vmatprep.mubr.msk.bf16.mxu1 %vm403_vm1, %v5097_v21  ;;  %v5142_v10 = vld [vmem:[%s5319_s29 + $0x40] sm:$0xff]   ;;  %v5143_v11 = vld [vmem:[%s5319_s29 + $0x48] sm:$0xff]   ;;  %v5145_v12 = vld [vmem:[%s5319_s29 + $0x50] sm:$0xff]  }
  0x28   : > { %v5144_v13 = vld [vmem:[%s5319_s29 + $0x48] sm:$0xff]   ;;  %v5146_v14 = vld [vmem:[%s5319_s29 + $0x50] sm:$0xff]   ;;  %v5147_v15 = vld [vmem:[%s5319_s29 + $0x58] sm:$0xff]  }
  0x29   : > { %v5149_v16 = vld [vmem:[%s5319_s29 + $0x60] sm:$0xff]   ;;  %v5148_v17 = vld [vmem:[%s5319_s29 + $0x58] sm:$0xff]   ;;  %v5151_v19 = vld [vmem:[%s5319_s29 + $0x68] sm:$0xff]  }
  0x2a   : > { %v5150_v18 = vld [vmem:[%s5319_s29 + $0x60] sm:$0xff]   ;;  %v5153_v20 = vld [vmem:[%s5319_s29 + $0x70] sm:$0xff]   ;;  %v5152_v21 = vld [vmem:[%s5319_s29 + $0x68] sm:$0xff]  }
  0x2d   : > { %4756 = vmatmul.mubr.msk.bf16.gmra.mxu0 %vm403_vm1, %v5098_v22  ;;  %v5155_v22 = vld [vmem:[%s5319_s29 + $0x78] sm:$0xff]  }
  0x2e   : > { %4772 = vmatmul.mubr.msk.bf16.gmra.mxu1 %vm403_vm1, %v5099_v23  ;;  %4811 = vmatprep.mubr.msk.bf16.mxu0 %vm403_vm1, %v5101_v24  ;;  %v5154_v23 = vld [vmem:[%s5319_s29 + $0x70] sm:$0xff]   ;;  %v5157_v24 = vld [vmem:[%s5319_s29 + $0x80] sm:$0xff]  }
  0x2f   : > { %4777 = vmatprep.mubr.msk.bf16.mxu1 %vm403_vm1, %v5100_v25  ;;  %v5156_v25 = vld [vmem:[%s5319_s29 + $0x78] sm:$0xff]  }
  0x35   : > { %4812 = vmatmul.mubr.msk.bf16.vlgmr.msra.gmra.mxu0 %vm403_vm1, %v5103_v26  ;;  %v5159_v26 = vld [vmem:[%s5319_s29 + $0x88] sm:$0xff]  }
  0x36   : > { %4778 = vmatmul.mubr.msk.bf16.vlgmr.msra.gmra.mxu1 %vm403_vm1, %v5102_v27  ;;  %4878 = vmatpush3.bf16.msra.mxu0 %v1806_v28  ;;  %v5158_v27 = vld [vmem:[%s5319_s29 + $0x80] sm:$0xff]   ;;  %v5161_v28 = vld [vmem:[%s5319_s29 + $0x90] sm:$0xff]  }
  0x37   : > { %4844 = vmatpush3.bf16.msra.mxu1 %v1442_v30  ;;  %4781 = vmatprep.mubr.msk.bf16.mxu1 %vm403_vm1, %v5104_v29  ;;  %v5160_v29 = vld [vmem:[%s5319_s29 + $0x88] sm:$0xff]   ;;  %v5163_v30 = vld [vmem:[%s5319_s29 + $0x98] sm:$0xff]  }
  0x38   : > { %4815 = vmatprep.mubr.msk.bf16.mxu0 %vm403_vm1, %v5105_v31  ;;  %5055 = vmatprep.subr.msk.bf16.mxu1 %vm452_vm0, %v5377_v32  ;;  %v5162_v31 = vld [vmem:[%s5319_s29 + $0x90] sm:$0xff]  }
  0x39   : > { %5056 = vmatprep.subr.msk.bf16.mxu0 %vm452_vm0, %v5383_v33  ;;  %v5165_v32 = vld [vmem:[%s5319_s29 + $0x30] sm:$0xff]   ;;  %v5164_v33 = vld [vmem:[%s5319_s29 + $0x28] sm:$0xff]  }
  0x3d   : > { %4816 = vmatmul.mubr.msk.bf16.gmra.mxu0 %vm403_vm1, %v5107_v35  ;;  %v5166_v35 = vld [vmem:[%s5319_s29 + $0x30] sm:$0xff]  }
  0x3e   : > { %4782 = vmatmul.mubr.msk.bf16.gmra.mxu1 %vm403_vm1, %v5106_v34  ;;  %4819 = vmatprep.mubr.msk.bf16.mxu0 %vm403_vm1, %v5109_v36  ;;  %v5167_v34 = vld [vmem:[%s5319_s29 + $0x38] sm:$0xff]   ;;  %v3262_v36 = vsel %vm452_vm0, %v5465_v5, 0 }
  0x3f   : > { %4785 = vmatprep.mubr.msk.bf16.mxu1 %vm403_vm1, %v5108_v37  ;;  %v5168_v37 = vld [vmem:[%s5319_s29 + $0x38] sm:$0xff]  }
  0x45   : > { %4820 = vmatmul.mubr.msk.bf16.gmra.mxu0 %vm403_vm1, %v5111_v39  ;;  %v5169_v39 = vld [vmem:[%s5319_s29 + $0x40] sm:$0xff]  }
  0x46   : > { %4786 = vmatmul.mubr.msk.bf16.gmra.mxu1 %vm403_vm1, %v5110_v38  ;;  %4823 = vmatprep.mubr.msk.bf16.mxu0 %vm403_vm1, %v5113_v40  ;;  %v2898_v38 = vsel %vm452_vm0, %v5459_v4, 0  ;;  %v5171_v40 = vld [vmem:[%s5319_s29 + $0x48] sm:$0xff]  }
  0x47   : > { %4789 = vmatprep.mubr.msk.bf16.mxu1 %vm403_vm1, %v5112_v41  ;;  %v5170_v41 = vld [vmem:[%s5319_s29 + $0x40] sm:$0xff]  }
  0x4d   : > { %4824 = vmatmul.mubr.msk.bf16.gmra.mxu0 %vm403_vm1, %v5115_v43  ;;  %v5172_v43 = vld [vmem:[%s5319_s29 + $0x48] sm:$0xff]  }
  0x4e   : > { %4790 = vmatmul.mubr.msk.bf16.gmra.mxu1 %vm403_vm1, %v5114_v42  ;;  %4827 = vmatprep.mubr.msk.bf16.mxu0 %vm403_vm1, %v5117_v44  ;;  %v5173_v42 = vld [vmem:[%s5319_s29 + $0x50] sm:$0xff]   ;;  %v5175_v44 = vld [vmem:[%s5319_s29 + $0x58] sm:$0xff]  }
  0x4f   : > { %4793 = vmatprep.mubr.msk.bf16.mxu1 %vm403_vm1, %v5116_v45  ;;  %v5174_v45 = vld [vmem:[%s5319_s29 + $0x50] sm:$0xff]  }
  0x55   : > { %4828 = vmatmul.mubr.msk.bf16.gmra.mxu0 %vm403_vm1, %v5119_v47  ;;  %v5176_v47 = vld [vmem:[%s5319_s29 + $0x58] sm:$0xff]  }
  0x56   : > { %4794 = vmatmul.mubr.msk.bf16.gmra.mxu1 %vm403_vm1, %v5118_v46  ;;  %4831 = vmatprep.mubr.msk.bf16.mxu0 %vm403_vm1, %v5121_v48  ;;  %v5177_v46 = vld [vmem:[%s5319_s29 + $0x60] sm:$0xff]   ;;  %v5179_v48 = vld [vmem:[%s5319_s29 + $0x68] sm:$0xff]  }
  0x57   : > { %4797 = vmatprep.mubr.msk.bf16.mxu1 %vm403_vm1, %v5120_v49  ;;  %v5178_v49 = vld [vmem:[%s5319_s29 + $0x60] sm:$0xff]  }
  0x5d   : > { %4832 = vmatmul.mubr.msk.bf16.gmra.mxu0 %vm403_vm1, %v5123_v51  ;;  %v5180_v51 = vld [vmem:[%s5319_s29 + $0x68] sm:$0xff]  }
  0x5e   : > { %4798 = vmatmul.mubr.msk.bf16.gmra.mxu1 %vm403_vm1, %v5122_v50  ;;  %4835 = vmatprep.mubr.msk.bf16.mxu0 %vm403_vm1, %v5125_v52  ;;  %v5181_v50 = vld [vmem:[%s5319_s29 + $0x70] sm:$0xff]   ;;  %v5183_v52 = vld [vmem:[%s5319_s29 + $0x78] sm:$0xff]  }
  0x5f   : > { %4801 = vmatprep.mubr.msk.bf16.mxu1 %vm403_vm1, %v5124_v53  ;;  %v5182_v53 = vld [vmem:[%s5319_s29 + $0x70] sm:$0xff]  }
  0x65   : > { %4836 = vmatmul.mubr.msk.bf16.gmra.mxu0 %vm403_vm1, %v5127_v55  ;;  %v5184_v55 = vld [vmem:[%s5319_s29 + $0x78] sm:$0xff]  }
  0x66   : > { %4802 = vmatmul.mubr.msk.bf16.gmra.mxu1 %vm403_vm1, %v5126_v54  ;;  %4839 = vmatprep.mubr.msk.bf16.mxu0 %vm403_vm1, %v5129_v56  ;;  %v5185_v54 = vld [vmem:[%s5319_s29 + $0x80] sm:$0xff]  }
  0x67   : > { %4805 = vmatprep.mubr.msk.bf16.mxu1 %vm403_vm1, %v5128_v57 }
  0x6d   : > { %4840 = vmatmul.mubr.msk.bf16.gmra.mxu0 %vm403_vm1, %v5131_v59 }
  0x6e   : > { %4806 = vmatmul.mubr.msk.bf16.gmra.mxu1 %vm403_vm1, %v5130_v58  ;;  %4879 = vmatprep.mubr.msk.bf16.mxu0 %vm403_vm1, %v5133_v60 }
  0x6f   : > { %4845 = vmatprep.mubr.msk.bf16.mxu1 %vm403_vm1, %v5132_v61  ;;  %v5187_v61 = vld [vmem:[%s5319_s29 + $0x88] sm:$0xff]  }
  0x75   : > { %4880 = vmatmul.mubr.msk.bf16.vlgmr.msra.gmra.mxu0 %vm403_vm1, %v5135_v62 }
  0x76   : > { %4846 = vmatmul.mubr.msk.bf16.vlgmr.msra.gmra.mxu1 %vm403_vm1, %v5134_v63  ;;  %4946 = vmatpush3.bf16.msra.mxu0 %v2534_v0  ;;  %v5186_v63 = vld [vmem:[%s5319_s29 + $0x80] sm:$0xff]   ;;  %v5189_v0 = vld [vmem:[%s5319_s29 + $0x90] sm:$0xff]  }
  0x77   : > { %4912 = vmatpush3.bf16.msra.mxu1 %v2170_v2  ;;  %4849 = vmatprep.mubr.msk.bf16.mxu1 %vm403_vm1, %v5136_v1  ;;  %v5188_v2 = vld [vmem:[%s5319_s29 + $0x88] sm:$0xff]  }
  0x78   : > { %4883 = vmatprep.mubr.msk.bf16.mxu0 %vm403_vm1, %v5137_v3  ;;  %5057 = vmatprep.subr.msk.bf16.mxu1 %vm452_vm0, %v5459_v4 }
  0x79   : > { %5058 = vmatprep.subr.msk.bf16.mxu0 %vm452_vm0, %v5465_v5 }
  0x7d   : > { %4884 = vmatmul.mubr.msk.bf16.gmra.mxu0 %vm403_vm1, %v5139_v7 }
  0x7e   : > { %4850 = vmatmul.mubr.msk.bf16.gmra.mxu1 %vm403_vm1, %v5138_v6  ;;  %4887 = vmatprep.mubr.msk.bf16.mxu0 %vm403_vm1, %v5141_v8 }
  0x7f   : > { %4853 = vmatprep.mubr.msk.bf16.mxu1 %vm403_vm1, %v5140_v9  ;;  %v5191_v9 = vld [vmem:[%s5319_s29 + $0x98] sm:$0xff]  }
  0x85   : > { %4888 = vmatmul.mubr.msk.bf16.gmra.mxu0 %vm403_vm1, %v5143_v11  ;;  %v5190_v11 = vld [vmem:[%s5319_s29 + $0x90] sm:$0xff]  }
  0x86   : > { %4854 = vmatmul.mubr.msk.bf16.gmra.mxu1 %vm403_vm1, %v5142_v10  ;;  %4891 = vmatprep.mubr.msk.bf16.mxu0 %vm403_vm1, %v5145_v12  ;;  %v5193_v12 = vld [vmem:[%s5319_s29 + $0xa0] sm:$0xff]  }
  0x87   : > { %4857 = vmatprep.mubr.msk.bf16.mxu1 %vm403_vm1, %v5144_v13 }
  0x8d   : > { %4892 = vmatmul.mubr.msk.bf16.gmra.mxu0 %vm403_vm1, %v5147_v15 }
  0x8e   : > { %4858 = vmatmul.mubr.msk.bf16.gmra.mxu1 %vm403_vm1, %v5146_v14  ;;  %4895 = vmatprep.mubr.msk.bf16.mxu0 %vm403_vm1, %v5149_v16  ;;  %v5192_v14 = vld [vmem:[%s5319_s29 + $0x98] sm:$0xff]  }
  0x8f   : > { %4861 = vmatprep.mubr.msk.bf16.mxu1 %vm403_vm1, %v5148_v17 }
  0x95   : > { %4896 = vmatmul.mubr.msk.bf16.gmra.mxu0 %vm403_vm1, %v5151_v19 }
  0x96   : > { %4862 = vmatmul.mubr.msk.bf16.gmra.mxu1 %vm403_vm1, %v5150_v18  ;;  %4899 = vmatprep.mubr.msk.bf16.mxu0 %vm403_vm1, %v5153_v20 }
  0x97   : > { %4865 = vmatprep.mubr.msk.bf16.mxu1 %vm403_vm1, %v5152_v21  ;;  %v5195_v21 = vld [vmem:[%s5319_s29 + $0xa8] sm:$0xff]  }
  0x9d   : > { %4900 = vmatmul.mubr.msk.bf16.gmra.mxu0 %vm403_vm1, %v5155_v22 }
  0x9e   : > { %4866 = vmatmul.mubr.msk.bf16.gmra.mxu1 %vm403_vm1, %v5154_v23  ;;  %4903 = vmatprep.mubr.msk.bf16.mxu0 %vm403_vm1, %v5157_v24  ;;  %v5194_v23 = vld [vmem:[%s5319_s29 + $0xa0] sm:$0xff]  }
  0x9f   : > { %4869 = vmatprep.mubr.msk.bf16.mxu1 %vm403_vm1, %v5156_v25  ;;  %v5197_v24 = vld [vmem:[%s5319_s29 + $0x40] sm:$0xff]  }
  0xa5   : > { %4904 = vmatmul.mubr.msk.bf16.gmra.mxu0 %vm403_vm1, %v5159_v26  ;;  %v5196_v26 = vld [vmem:[%s5319_s29 + $0x38] sm:$0xff]  }
  0xa6   : > { %4870 = vmatmul.mubr.msk.bf16.gmra.mxu1 %vm403_vm1, %v5158_v27  ;;  %4907 = vmatprep.mubr.msk.bf16.mxu0 %vm403_vm1, %v5161_v28 }
  0xa7   : > { %4873 = vmatprep.mubr.msk.bf16.mxu1 %vm403_vm1, %v5160_v29 }
  0xad   : > { %4908 = vmatmul.mubr.msk.bf16.gmra.mxu0 %vm403_vm1, %v5163_v30 }
  0xae   : > { %4874 = vmatmul.mubr.msk.bf16.gmra.mxu1 %vm403_vm1, %v5162_v31  ;;  %4947 = vmatprep.mubr.msk.bf16.mxu0 %vm403_vm1, %v5165_v32 }
  0xaf   : > { %4913 = vmatprep.mubr.msk.bf16.mxu1 %vm403_vm1, %v5164_v33  ;;  %v5199_v33 = vld [vmem:[%s5319_s29 + $0x48] sm:$0xff]  }
  0xb5   : > { %4948 = vmatmul.mubr.msk.bf16.vlgmr.msra.gmra.mxu0 %vm403_vm1, %v5167_v34 }
  0xb6   : > { %4914 = vmatmul.mubr.msk.bf16.vlgmr.msra.gmra.mxu1 %vm403_vm1, %v5166_v35  ;;  %5014 = vmatpush3.bf16.msra.mxu0 %v3262_v36  ;;  %v5198_v35 = vld [vmem:[%s5319_s29 + $0x40] sm:$0xff]   ;;  %v5201_v36 = vld [vmem:[%s5319_s29 + $0x50] sm:$0xff]  }
  0xb7   : > { %4980 = vmatpush3.bf16.msra.mxu1 %v2898_v38  ;;  %4917 = vmatprep.mubr.msk.bf16.mxu1 %vm403_vm1, %v5168_v37  ;;  %v5200_v38 = vld [vmem:[%s5319_s29 + $0x48] sm:$0xff]  }
  0xb8   : > { %4951 = vmatprep.mubr.msk.bf16.mxu0 %vm403_vm1, %v5169_v39 }
  0xbd   : > { %4952 = vmatmul.mubr.msk.bf16.gmra.mxu0 %vm403_vm1, %v5171_v40 }
  0xbe   : > { %4918 = vmatmul.mubr.msk.bf16.gmra.mxu1 %vm403_vm1, %v5170_v41  ;;  %4955 = vmatprep.mubr.msk.bf16.mxu0 %vm403_vm1, %v5173_v42 }
  0xbf   : > { %4921 = vmatprep.mubr.msk.bf16.mxu1 %vm403_vm1, %v5172_v43 }
  0xc5   : > { %4956 = vmatmul.mubr.msk.bf16.gmra.mxu0 %vm403_vm1, %v5175_v44 }
  0xc6   : > { %4922 = vmatmul.mubr.msk.bf16.gmra.mxu1 %vm403_vm1, %v5174_v45  ;;  %4959 = vmatprep.mubr.msk.bf16.mxu0 %vm403_vm1, %v5177_v46 }
  0xc7   : > { %4925 = vmatprep.mubr.msk.bf16.mxu1 %vm403_vm1, %v5176_v47 }
  0xcd   : > { %4960 = vmatmul.mubr.msk.bf16.gmra.mxu0 %vm403_vm1, %v5179_v48  ;;  %v5203_v48 = vld [vmem:[%s5319_s29 + $0x58] sm:$0xff]  }
  0xce   : > { %4926 = vmatmul.mubr.msk.bf16.gmra.mxu1 %vm403_vm1, %v5178_v49  ;;  %4963 = vmatprep.mubr.msk.bf16.mxu0 %vm403_vm1, %v5181_v50  ;;  %v5202_v50 = vld [vmem:[%s5319_s29 + $0x50] sm:$0xff]  }
  0xcf   : > { %4929 = vmatprep.mubr.msk.bf16.mxu1 %vm403_vm1, %v5180_v51  ;;  %v5205_v51 = vld [vmem:[%s5319_s29 + $0x60] sm:$0xff]  }
  0xd5   : > { %v5569_v56 = vpop.f32.mrf.mxu0  ;;  %4964 = vmatmul.mubr.msk.bf16.gmra.mxu0 %vm403_vm1, %v5183_v52 }
  0xd6   : > { %v5572_v57 = vpop.f32.mrf.mxu1  ;;  %4930 = vmatmul.mubr.msk.bf16.gmra.mxu1 %vm403_vm1, %v5182_v53  ;;  %4967 = vmatprep.mubr.msk.bf16.mxu0 %vm403_vm1, %v5185_v54 }
  0xd7   : > { %v5576_v58 = vpop.f32.mrf.mxu0  ;;  %4933 = vmatprep.mubr.msk.bf16.mxu1 %vm403_vm1, %v5184_v55  ;;  %v5204_v55 = vld [vmem:[%s5319_s29 + $0x58] sm:$0xff]  }
  0xd8   : > { %v5579_v59 = vpop.f32.mrf.mxu1 }
  0xd9   : > { %v5581_v60 = vpop.f32.mrf.mxu0 }
  0xda   : > { %v5584_v62 = vpop.f32.mrf.mxu1 }
  0xdb   : > { %v5588_v1 = vpop.f32.mrf.mxu0 }
  0xdc   : > { %v5591_v3 = vpop.f32.mrf.mxu1 }
  0xdd   : > { %v5593_v4 = vpop.f32.mrf.mxu0  ;;  %4968 = vmatmul.mubr.msk.bf16.gmra.mxu0 %vm403_vm1, %v5187_v61 }
  0xde   : > { %v5596_v5 = vpop.f32.mrf.mxu1  ;;  %4934 = vmatmul.mubr.msk.bf16.gmra.mxu1 %vm403_vm1, %v5186_v63  ;;  %4971 = vmatprep.mubr.msk.bf16.mxu0 %vm403_vm1, %v5189_v0 }
  0xdf   : > { %v5600_v6 = vpop.f32.mrf.mxu0  ;;  %4937 = vmatprep.mubr.msk.bf16.mxu1 %vm403_vm1, %v5188_v2 }
  0xe0   : > { %v5603_v7 = vpop.f32.mrf.mxu1 }
  0xe1   : > { %v5605_v8 = vpop.f32.mrf.mxu0 }
  0xe2   : > { %v5608_v10 = vpop.f32.mrf.mxu1 }
  0xe3   : > { %v5612_v13 = vpop.f32.mrf.mxu0 }
  0xe4   : > { %v5615_v15 = vpop.f32.mrf.mxu1 }
  0xe5   : > { %v5617_v16 = vpop.f32.mrf.mxu0  ;;  %4972 = vmatmul.mubr.msk.bf16.gmra.mxu0 %vm403_vm1, %v5191_v9 }
  0xe6   : > { %v5620_v17 = vpop.f32.mrf.mxu1  ;;  %4938 = vmatmul.mubr.msk.bf16.gmra.mxu1 %vm403_vm1, %v5190_v11  ;;  %4975 = vmatprep.mubr.msk.bf16.mxu0 %vm403_vm1, %v5193_v12 }
  0xe7   : > { %v5624_v18 = vpop.f32.mrf.mxu0  ;;  %4941 = vmatprep.mubr.msk.bf16.mxu1 %vm403_vm1, %v5192_v14 }
  0xe8   : > { %v5627_v19 = vpop.f32.mrf.mxu1 }
  0xe9   : > { %v5629_v20 = vpop.f32.mrf.mxu0 }
  0xea   : > { %v5632_v22 = vpop.f32.mrf.mxu1 }
  0xeb   : > { %v5636_v25 = vpop.f32.mrf.mxu0 }
  0xec   : > { %v5639_v27 = vpop.f32.mrf.mxu1 }
  0xed   : > { %v5641_v28 = vpop.f32.mrf.mxu0  ;;  %4976 = vmatmul.mubr.msk.bf16.gmra.mxu0 %vm403_vm1, %v5195_v21  ;;  %v5207_v21 = vld [vmem:[%s5319_s29 + $0x68] sm:$0xff]  }
  0xee   : > { %v5644_v29 = vpop.f32.mrf.mxu1  ;;  %4942 = vmatmul.mubr.msk.bf16.gmra.mxu1 %vm403_vm1, %v5194_v23  ;;  %5015 = vmatprep.mubr.msk.bf16.mxu0 %vm403_vm1, %v5197_v24  ;;  %v5206_v24 = vld [vmem:[%s5319_s29 + $0x60] sm:$0xff]  }
  0xef   : > { %v5648_v30 = vpop.f32.mrf.mxu0  ;;  %4981 = vmatprep.mubr.msk.bf16.mxu1 %vm403_vm1, %v5196_v26  ;;  %v5209_v26 = vld [vmem:[%s5319_s29 + $0x70] sm:$0xff]  }
  0xf0   : > { %v5651_v31 = vpop.f32.mrf.mxu1 }
  0xf1   : > { %v5653_v32 = vpop.f32.mrf.mxu0 }
  0xf2   : > { %v5656_v34 = vpop.f32.mrf.mxu1 }
  0xf3   : > { %v5660_v37 = vpop.f32.mrf.mxu0 }
  0xf4   : > { %v5663_v39 = vpop.f32.mrf.mxu1 }
  0xf5   : > { %v4813_v40 = vpop.f32.mrf.mxu0  ;;  %5016 = vmatmul.mubr.msk.bf16.vlgmr.msra.gmra.mxu0 %vm403_vm1, %v5199_v33 }
  0xf6   : > { %v4779_v41 = vpop.f32.mrf.mxu1  ;;  %4982 = vmatmul.mubr.msk.bf16.vlgmr.msra.gmra.mxu1 %vm403_vm1, %v5198_v35  ;;  %5019 = vmatprep.mubr.msk.bf16.mxu0 %vm403_vm1, %v5201_v36 }
  0xf7   : > { %v791_v42 = vadd.f32 %v4779_v41, %v5569_v56  ;;  %v1114_v43 = vpop.f32.mrf.mxu0  ;;  %4985 = vmatprep.mubr.msk.bf16.mxu1 %vm403_vm1, %v5200_v38  ;;  %v5208_v38 = vld [vmem:[%s5319_s29 + $0x68] sm:$0xff]  }
  0xf8   : > { %v782_v44 = vpop.f32.mrf.mxu1 }
  0xf9   : > { %v5670_v45 = vadd.f32 %v4813_v40, %v791_v42  ;;  %v783_v46 = vadd.f32 %v782_v44, %v5576_v58  ;;  %v4814_v47 = vpop.f32.mrf.mxu0 }
  0xfa   : > { %v4780_v49 = vpop.f32.mrf.mxu1 }
  0xfb   : > { %v5676_v52 = vadd.f32 %v1114_v43, %v783_v46  ;;  %v794_v53 = vadd.f32 %v4780_v49, %v5581_v60  ;;  %v1117_v54 = vpop.f32.mrf.mxu0  ;;  %v5211_v49 = vld [vmem:[%s5319_s29 + $0x78] sm:$0xff]  }
  0xfc   : > { %v785_v56 = vpop.f32.mrf.mxu1 }
  0xfd   : > { %v5680_v61 = vadd.f32 %v4814_v47, %v794_v53  ;;  %v786_v63 = vadd.f32 %v785_v56, %v5588_v1  ;;  %v4817_v0 = vpop.f32.mrf.mxu0  ;;  %5020 = vmatmul.mubr.msk.bf16.gmra.mxu0 %vm403_vm1, %v5203_v48  ;;  %v5213_v53 = vld [vmem:[%s5319_s29 + $0x80] sm:$0xff]  }
  0xfe   : > { %v4783_v58 = vpop.f32.mrf.mxu1  ;;  %4986 = vmatmul.mubr.msk.bf16.gmra.mxu1 %vm403_vm1, %v5202_v50  ;;  %5023 = vmatprep.mubr.msk.bf16.mxu0 %vm403_vm1, %v5205_v51  ;;  %v5210_v51 = vld [vmem:[%s5319_s29 + $0x70] sm:$0xff]  }
  0xff   : > { %v5686_v60 = vadd.f32 %v1117_v54, %v786_v63  ;;  %v807_v2 = vadd.f32 %v4783_v58, %v5593_v4  ;;  %v1130_v9 = vpop.f32.mrf.mxu0  ;;  %4989 = vmatprep.mubr.msk.bf16.mxu1 %vm403_vm1, %v5204_v55  ;;  %v5212_v63 = vld [vmem:[%s5319_s29 + $0x78] sm:$0xff]  }
 0x100   : > { %v798_v11 = vpop.f32.mrf.mxu1 }
 0x101   : > { %v5690_v1 = vadd.f32 %v4817_v0, %v807_v2  ;;  %v799_v12 = vadd.f32 %v798_v11, %v5600_v6  ;;  %v4818_v14 = vpop.f32.mrf.mxu0 }
 0x102   : > { %v4784_v23 = vpop.f32.mrf.mxu1 }
 0x103   : > { %v5696_v33 = vadd.f32 %v1130_v9, %v799_v12  ;;  %v810_v35 = vadd.f32 %v4784_v23, %v5605_v8  ;;  %v1133_v36 = vpop.f32.mrf.mxu0  ;;  %v5215_v23 = vld [vmem:[%s5319_s29 + $0x88] sm:$0xff]  }
 0x104   : > { %v801_v4 = vpop.f32.mrf.mxu1 }
 0x105   : > { %v5700_v40 = vadd.f32 %v4818_v14, %v810_v35  ;;  %v802_v41 = vadd.f32 %v801_v4, %v5612_v13  ;;  %v4821_v42 = vpop.f32.mrf.mxu0  ;;  %5024 = vmatmul.mubr.msk.bf16.gmra.mxu0 %vm403_vm1, %v5207_v21  ;;  %v5217_v35 = vld [vmem:[%s5319_s29 + $0x90] sm:$0xff]  }
 0x106   : > { %v4787_v6 = vpop.f32.mrf.mxu1  ;;  %4990 = vmatmul.mubr.msk.bf16.gmra.mxu1 %vm403_vm1, %v5206_v24  ;;  %5027 = vmatprep.mubr.msk.bf16.mxu0 %vm403_vm1, %v5209_v26  ;;  %v5214_v26 = vld [vmem:[%s5319_s29 + $0x80] sm:$0xff]  }
 0x107   : > { %v5706_v8 = vadd.f32 %v1133_v36, %v802_v41  ;;  %v823_v43 = vadd.f32 %v4787_v6, %v5617_v16  ;;  %v1146_v44 = vpop.f32.mrf.mxu0  ;;  %4993 = vmatprep.mubr.msk.bf16.mxu1 %vm403_vm1, %v5208_v38  ;;  %v5216_v41 = vld [vmem:[%s5319_s29 + $0x88] sm:$0xff]  }
 0x108   : > { %v814_v46 = vpop.f32.mrf.mxu1 }
 0x109   : > { %v5710_v13 = vadd.f32 %v4821_v42, %v823_v43  ;;  %v815_v47 = vadd.f32 %v814_v46, %v5624_v18  ;;  %v4822_v48 = vpop.f32.mrf.mxu0 }
 0x10a   : > { %v4788_v50 = vpop.f32.mrf.mxu1 }
 0x10b   : > { %v5716_v54 = vadd.f32 %v1146_v44, %v815_v47  ;;  %v826_v55 = vadd.f32 %v4788_v50, %v5629_v20  ;;  %v1149_v56 = vpop.f32.mrf.mxu0  ;;  %v5219_v50 = vld [vmem:[%s5319_s29 + $0x98] sm:$0xff]  }
 0x10c   : > { %v817_v16 = vpop.f32.mrf.mxu1 }
 0x10d   : > { %v5720_v0 = vadd.f32 %v4822_v48, %v826_v55  ;;  %v818_v58 = vadd.f32 %v817_v16, %v5636_v25  ;;  %v4825_v2 = vpop.f32.mrf.mxu0  ;;  %5028 = vmatmul.mubr.msk.bf16.gmra.mxu0 %vm403_vm1, %v5211_v49  ;;  %v5221_v55 = vld [vmem:[%s5319_s29 + $0xa0] sm:$0xff]  }
 0x10e   : > { %v4791_v18 = vpop.f32.mrf.mxu1  ;;  %4994 = vmatmul.mubr.msk.bf16.gmra.mxu1 %vm403_vm1, %v5210_v51  ;;  %5031 = vmatprep.mubr.msk.bf16.mxu0 %vm403_vm1, %v5213_v53  ;;  %v5218_v53 = vld [vmem:[%s5319_s29 + $0x90] sm:$0xff]  }
 0x10f   : > { %v5726_v20 = vadd.f32 %v1149_v56, %v818_v58  ;;  %v839_v9 = vadd.f32 %v4791_v18, %v5641_v28  ;;  %v1162_v11 = vpop.f32.mrf.mxu0  ;;  %4997 = vmatprep.mubr.msk.bf16.mxu1 %vm403_vm1, %v5212_v63  ;;  %v5220_v58 = vld [vmem:[%s5319_s29 + $0x98] sm:$0xff]  }
 0x110   : > { %v830_v12 = vpop.f32.mrf.mxu1 }
 0x111   : > { %v5730_v25 = vadd.f32 %v4825_v2, %v839_v9  ;;  %v831_v14 = vadd.f32 %v830_v12, %v5648_v30  ;;  %v4826_v21 = vpop.f32.mrf.mxu0 }
 0x112   : > { %v4792_v24 = vpop.f32.mrf.mxu1 }
 0x113   : > { %v5736_v36 = vadd.f32 %v1162_v11, %v831_v14  ;;  %v842_v38 = vadd.f32 %v4792_v24, %v5653_v32  ;;  %v1165_v4 = vpop.f32.mrf.mxu0  ;;  %v5223_v24 = vld [vmem:[%s5319_s29 + $0xa8] sm:$0xff]  }
 0x114   : > { %v833_v28 = vpop.f32.mrf.mxu1 }
 0x115   : > { %v5740_v42 = vadd.f32 %v4826_v21, %v842_v38  ;;  %v834_v6 = vadd.f32 %v833_v28, %v5660_v37  ;;  %v4829_v43 = vpop.f32.mrf.mxu0  ;;  %5032 = vmatmul.mubr.msk.bf16.gmra.mxu0 %vm403_vm1, %v5215_v23  ;;  %v5225_v38 = vld [vmem:[%s5319_s29 + $0xb0] sm:$0xff]  }
 0x116   : > { %v4795_v30 = vpop.f32.mrf.mxu1  ;;  %4998 = vmatmul.mubr.msk.bf16.gmra.mxu1 %vm403_vm1, %v5214_v26  ;;  %5035 = vmatprep.mubr.msk.bf16.mxu0 %vm403_vm1, %v5217_v35  ;;  %v5222_v35 = vld [vmem:[%s5319_s29 + $0xa0] sm:$0xff]  }
 0x117   : > { %v5746_v32 = vadd.f32 %v1165_v4, %v834_v6  ;;  %v855_v44 = vadd.f32 %v4795_v30, %v5572_v57  ;;  %v1178_v46 = vpop.f32.mrf.mxu0  ;;  %5001 = vmatprep.mubr.msk.bf16.mxu1 %vm403_vm1, %v5216_v41  ;;  %v5224_v6 = vld [vmem:[%s5319_s29 + $0xa8] sm:$0xff]  }
 0x118   : > { %v846_v47 = vpop.f32.mrf.mxu1 }
 0x119   : > { %v5750_v37 = vadd.f32 %v4829_v43, %v855_v44  ;;  %v847_v48 = vadd.f32 %v846_v47, %v5579_v59  ;;  %v4830_v49 = vpop.f32.mrf.mxu0 }
 0x11a   : > { %v4796_v51 = vpop.f32.mrf.mxu1 }
 0x11b   : > { %v5756_v56 = vadd.f32 %v1178_v46, %v847_v48  ;;  %v858_v63 = vadd.f32 %v4796_v51, %v5584_v62  ;;  %v1181_v16 = vpop.f32.mrf.mxu0  ;;  %v5227_v51 = vld [vmem:[%s5319_s29 + $0xb8] sm:$0xff]  }
 0x11c   : > { %v849_v57 = vpop.f32.mrf.mxu1 }
 0x11d   : > { %v5760_v2 = vadd.f32 %v4830_v49, %v858_v63  ;;  %v850_v18 = vadd.f32 %v849_v57, %v5591_v3  ;;  %v4833_v9 = vpop.f32.mrf.mxu0  ;;  %5036 = vmatmul.mubr.msk.bf16.gmra.mxu0 %vm403_vm1, %v5219_v50 }
 0x11e   : > { %v4799_v59 = vpop.f32.mrf.mxu1  ;;  %5002 = vmatmul.mubr.msk.bf16.gmra.mxu1 %vm403_vm1, %v5218_v53  ;;  %5039 = vmatprep.mubr.msk.bf16.mxu0 %vm403_vm1, %v5221_v55  ;;  %v5226_v55 = vld [vmem:[%s5319_s29 + $0xb0] sm:$0xff]  }
 0x11f   : > { %v5766_v62 = vadd.f32 %v1181_v16, %v850_v18  ;;  %v871_v11 = vadd.f32 %v4799_v59, %v5596_v5  ;;  %v1194_v12 = vpop.f32.mrf.mxu0  ;;  %5005 = vmatprep.mubr.msk.bf16.mxu1 %vm403_vm1, %v5220_v58 }
 0x120   : > { %v862_v14 = vpop.f32.mrf.mxu1 }
 0x121   : > { %v5770_v3 = vadd.f32 %v4833_v9, %v871_v11  ;;  %v863_v21 = vadd.f32 %v862_v14, %v5603_v7  ;;  %v4834_v23 = vpop.f32.mrf.mxu0 }
 0x122   : > { %v4800_v26 = vpop.f32.mrf.mxu1 }
 0x123   : > { %v5776_v4 = vadd.f32 %v1194_v12, %v863_v21  ;;  %v874_v41 = vadd.f32 %v4800_v26, %v5608_v10  ;;  %v1197_v28 = vpop.f32.mrf.mxu0 }
 0x124   : > { %v865_v5 = vpop.f32.mrf.mxu1 }
 0x125   : > { %v5780_v43 = vadd.f32 %v4834_v23, %v874_v41  ;;  %v866_v30 = vadd.f32 %v865_v5, %v5615_v15  ;;  %v4837_v44 = vpop.f32.mrf.mxu0  ;;  %5040 = vmatmul.mubr.msk.bf16.gmra.mxu0 %vm403_vm1, %v5223_v24 }
 0x126   : > { %v4803_v7 = vpop.f32.mrf.mxu1  ;;  %5006 = vmatmul.mubr.msk.bf16.gmra.mxu1 %vm403_vm1, %v5222_v35  ;;  %5043 = vmatprep.mubr.msk.bf16.mxu0 %vm403_vm1, %v5225_v38 }
 0x127   : > { %v5786_v46 = vadd.f32 %v1197_v28, %v866_v30  ;;  %v887_v10 = vadd.f32 %v4803_v7, %v5620_v17  ;;  %v1210_v47 = vpop.f32.mrf.mxu0  ;;  %5009 = vmatprep.mubr.msk.bf16.mxu1 %vm403_vm1, %v5224_v6 }
 0x128   : > { %v878_v48 = vpop.f32.mrf.mxu1 }
 0x129   : > { %v5790_v49 = vadd.f32 %v4837_v44, %v887_v10  ;;  %v879_v15 = vadd.f32 %v878_v48, %v5627_v19  ;;  %v4838_v50 = vpop.f32.mrf.mxu0 }
 0x12a   : > { %v4804_v53 = vpop.f32.mrf.mxu1 }
 0x12b   : > { %v5795_v63 = vadd.f32 %v1210_v47, %v879_v15  ;;  %v890_v16 = vadd.f32 %v4804_v53, %v5632_v22  ;;  %v1213_v58 = vpop.f32.mrf.mxu0 }
 0x12c   : > { %v881_v57 = vpop.f32.mrf.mxu1 }
 0x12d   : > { %v5798_v18 = vadd.f32 %v4838_v50, %v890_v16  ;;  %v882_v17 = vadd.f32 %v881_v57, %v5639_v27  ;;  %v4841_v9 = vpop.f32.mrf.mxu0  ;;  %5044 = vmatmul.mubr.msk.bf16.gmra.mxu0 %vm403_vm1, %v5227_v51 }
 0x12e   : > { %v4807_v59 = vpop.f32.mrf.mxu1  ;;  %5010 = vmatmul.mubr.msk.bf16.gmra.mxu1 %vm403_vm1, %v5226_v55 }
 0x12f   : > { %v5803_v19 = vadd.f32 %v1213_v58, %v882_v17  ;;  %v903_v11 = vadd.f32 %v4807_v59, %v5644_v29  ;;  %v1226_v12 = vpop.f32.mrf.mxu0 }
 0x130   : > { %v894_v14 = vpop.f32.mrf.mxu1 }
 0x131   : > { %v5806_v21 = vadd.f32 %v4841_v9, %v903_v11  ;;  %v895_v22 = vadd.f32 %v894_v14, %v5651_v31  ;;  %v4842_v23 = vpop.f32.mrf.mxu0 }
 0x132   : > { %v4808_v24 = vpop.f32.mrf.mxu1 }
 0x133   : > { %v5809_v26 = vadd.f32 %v1226_v12, %v895_v22  ;;  %v906_v27 = vadd.f32 %v4808_v24, %v5656_v34  ;;  %v1229_v35 = vpop.f32.mrf.mxu0 }
 0x134   : > { %v897_v38 = vpop.f32.mrf.mxu1 }
 0x135   : > { %v5812_v41 = vadd.f32 %v4842_v23, %v906_v27  ;;  %v898_v28 = vadd.f32 %v897_v38, %v5663_v39  ;;  %v4881_v6 = vpop.f32.mrf.mxu0 }
 0x136   : > { %v4847_v29 = vpop.f32.mrf.mxu1 }
 0x137   : > { %v5815_v5 = vadd.f32 %v1229_v35, %v898_v28  ;;  %v1607_v30 = vadd.f32 %v4847_v29, %v5670_v45  ;;  %v1842_v44 = vpop.f32.mrf.mxu0 }
 0x138   : > { %v1478_v31 = vpop.f32.mrf.mxu1 }
 0x139   : > { %v5818_v7 = vadd.f32 %v4881_v6, %v1607_v30  ;;  %v1605_v10 = vadd.f32 %v1478_v31, %v5676_v52  ;;  %v4882_v47 = vpop.f32.mrf.mxu0 }
 0x13a   : > { %v4848_v34 = vpop.f32.mrf.mxu1 }
 0x13b   : > { %v5821_v48 = vadd.f32 %v1842_v44, %v1605_v10  ;;  %v1608_v15 = vadd.f32 %v4848_v34, %v5680_v61  ;;  %v1845_v50 = vpop.f32.mrf.mxu0 }
 0x13c   : > { %v1481_v39 = vpop.f32.mrf.mxu1 }
 0x13d   : > { %v5824_v51 = vadd.f32 %v4882_v47, %v1608_v15  ;;  %v1606_v53 = vadd.f32 %v1481_v39, %v5686_v60  ;;  %v4885_v55 = vpop.f32.mrf.mxu0 }
 0x13e   : > { %v4851_v45 = vpop.f32.mrf.mxu1 }
 0x13f   : > { %v5827_v16 = vadd.f32 %v1845_v50, %v1606_v53  ;;  %v1611_v58 = vadd.f32 %v4851_v45, %v5690_v1  ;;  %v1858_v57 = vpop.f32.mrf.mxu0 }
 0x140   : > { %v1494_v52 = vpop.f32.mrf.mxu1 }
 0x141   : > { %v5830_v17 = vadd.f32 %v4885_v55, %v1611_v58  ;;  %v1609_v9 = vadd.f32 %v1494_v52, %v5696_v33  ;;  %v4886_v59 = vpop.f32.mrf.mxu0 }
 0x142   : > { %v4852_v61 = vpop.f32.mrf.mxu1 }
 0x143   : > { %v5833_v11 = vadd.f32 %v1858_v57, %v1609_v9  ;;  %v1612_v12 = vadd.f32 %v4852_v61, %v5700_v40  ;;  %v1861_v14 = vpop.f32.mrf.mxu0 }
 0x144   : > { %v1497_v60 = vpop.f32.mrf.mxu1 }
 0x145   : > { %v5836_v22 = vadd.f32 %v4886_v59, %v1612_v12  ;;  %v1610_v23 = vadd.f32 %v1497_v60, %v5706_v8  ;;  %v4889_v24 = vpop.f32.mrf.mxu0 }
 0x146   : > { %v4855_v1 = vpop.f32.mrf.mxu1 }
 0x147   : > { %v5839_v27 = vadd.f32 %v1861_v14, %v1610_v23  ;;  %v1615_v35 = vadd.f32 %v4855_v1, %v5710_v13  ;;  %v1874_v38 = vpop.f32.mrf.mxu0 }
 0x148   : > { %v1510_v33 = vpop.f32.mrf.mxu1 }
 0x149   : > { %v5842_v28 = vadd.f32 %v4889_v24, %v1615_v35  ;;  %v1613_v6 = vadd.f32 %v1510_v33, %v5716_v54  ;;  %v4890_v29 = vpop.f32.mrf.mxu0 }
 0x14a   : > { %v4856_v40 = vpop.f32.mrf.mxu1 }
 0x14b   : > { %v5845_v30 = vadd.f32 %v1874_v38, %v1613_v6  ;;  %v1616_v44 = vadd.f32 %v4856_v40, %v5720_v0  ;;  %v1877_v31 = vpop.f32.mrf.mxu0 }
 0x14c   : > { %v1513_v8 = vpop.f32.mrf.mxu1 }
 0x14d   : > { %v5848_v10 = vadd.f32 %v4890_v29, %v1616_v44  ;;  %v1614_v47 = vadd.f32 %v1513_v8, %v5726_v20  ;;  %v4893_v34 = vpop.f32.mrf.mxu0 }
 0x14e   : > { %v4859_v13 = vpop.f32.mrf.mxu1 }
 0x14f   : > { %v5851_v15 = vadd.f32 %v1877_v31, %v1614_v47  ;;  %v1619_v50 = vadd.f32 %v4859_v13, %v5730_v25  ;;  %v1890_v39 = vpop.f32.mrf.mxu0 }
 0x150   : > { %v1526_v54 = vpop.f32.mrf.mxu1 }
 0x151   : > { %v5854_v53 = vadd.f32 %v4893_v34, %v1619_v50  ;;  %v1617_v55 = vadd.f32 %v1526_v54, %v5736_v36  ;;  %v4894_v45 = vpop.f32.mrf.mxu0 }
 0x152   : > { %v4860_v0 = vpop.f32.mrf.mxu1 }
 0x153   : > { %v5857_v58 = vadd.f32 %v1890_v39, %v1617_v55  ;;  %v1620_v57 = vadd.f32 %v4860_v0, %v5740_v42  ;;  %v1893_v52 = vpop.f32.mrf.mxu0 }
 0x154   : > { %v1529_v20 = vpop.f32.mrf.mxu1 }
 0x155   : > { %v5860_v9 = vadd.f32 %v4894_v45, %v1620_v57  ;;  %v1618_v59 = vadd.f32 %v1529_v20, %v5746_v32  ;;  %v4897_v61 = vpop.f32.mrf.mxu0 }
 0x156   : > { %v4863_v25 = vpop.f32.mrf.mxu1 }
 0x157   : > { %v5863_v12 = vadd.f32 %v1893_v52, %v1618_v59  ;;  %v1623_v14 = vadd.f32 %v4863_v25, %v5750_v37  ;;  %v1906_v60 = vpop.f32.mrf.mxu0 }
 0x158   : > { %v1542_v36 = vpop.f32.mrf.mxu1 }
 0x159   : > { %v5866_v23 = vadd.f32 %v4897_v61, %v1623_v14  ;;  %v1621_v24 = vadd.f32 %v1542_v36, %v5756_v56  ;;  %v4898_v1 = vpop.f32.mrf.mxu0 }
 0x15a   : > { %v4864_v42 = vpop.f32.mrf.mxu1 }
 0x15b   : > { %v5869_v35 = vadd.f32 %v1906_v60, %v1621_v24  ;;  %v1624_v38 = vadd.f32 %v4864_v42, %v5760_v2  ;;  %v1909_v33 = vpop.f32.mrf.mxu0 }
 0x15c   : > { %v1545_v32 = vpop.f32.mrf.mxu1 }
 0x15d   : > { %v5872_v6 = vadd.f32 %v4898_v1, %v1624_v38  ;;  %v1622_v29 = vadd.f32 %v1545_v32, %v5766_v62  ;;  %v4901_v40 = vpop.f32.mrf.mxu0 }
 0x15e   : > { %v4867_v37 = vpop.f32.mrf.mxu1 }
 0x15f   : > { %v5875_v44 = vadd.f32 %v1909_v33, %v1622_v29  ;;  %v1627_v31 = vadd.f32 %v4867_v37, %v5770_v3  ;;  %v1922_v8 = vpop.f32.mrf.mxu0 }
 0x160   : > { %v1558_v56 = vpop.f32.mrf.mxu1 }
 0x161   : > { %v5878_v47 = vadd.f32 %v4901_v40, %v1627_v31  ;;  %v1625_v34 = vadd.f32 %v1558_v56, %v5776_v4  ;;  %v4902_v13 = vpop.f32.mrf.mxu0 }
 0x162   : > { %v4868_v2 = vpop.f32.mrf.mxu1 }
 0x163   : > { %v5881_v50 = vadd.f32 %v1922_v8, %v1625_v34  ;;  %v1628_v39 = vadd.f32 %v4868_v2, %v5780_v43  ;;  %v1925_v54 = vpop.f32.mrf.mxu0 }
 0x164   : > { %v1561_v62 = vpop.f32.mrf.mxu1 }
 0x165   : > { %6154 = vst [vmem:[#allocation2_spill] sm:$0xff] %v5881_v50  ;;  %v5884_v55 = vadd.f32 %v4902_v13, %v1628_v39  ;;  %v1626_v45 = vadd.f32 %v1561_v62, %v5786_v46  ;;  %v4905_v0 = vpop.f32.mrf.mxu0 }
 0x166   : > { %v4871_v3 = vpop.f32.mrf.mxu1 }
 0x167   : > { %6155 = vst [vmem:[#allocation3_spill] sm:$0xff] %v5884_v55  ;;  %v5887_v57 = vadd.f32 %v1925_v54, %v1626_v45  ;;  %v1631_v52 = vadd.f32 %v4871_v3, %v5790_v49  ;;  %v1938_v20 = vpop.f32.mrf.mxu0 }
 0x168   : > { %v1574_v4 = vpop.f32.mrf.mxu1 }
 0x169   : > { %6156 = vst [vmem:[#allocation4_spill] sm:$0xff] %v5887_v57  ;;  %v5890_v59 = vadd.f32 %v4905_v0, %v1631_v52  ;;  %v1629_v61 = vadd.f32 %v1574_v4, %v5795_v63  ;;  %v4906_v25 = vpop.f32.mrf.mxu0 }
 0x16a   : > { %v4872_v43 = vpop.f32.mrf.mxu1 }
 0x16b   : > { %v5893_v14 = vadd.f32 %v1938_v20, %v1629_v61  ;;  %v1632_v60 = vadd.f32 %v4872_v43, %v5798_v18  ;;  %v1941_v36 = vpop.f32.mrf.mxu0 }
 0x16c   : > { %v1577_v46 = vpop.f32.mrf.mxu1 }
 0x16d   : > { %6157 = vst [vmem:[#allocation5_spill] sm:$0xff] %v5893_v14  ;;  %v5896_v24 = vadd.f32 %v4906_v25, %v1632_v60  ;;  %v1630_v1 = vadd.f32 %v1577_v46, %v5803_v19  ;;  %v4909_v42 = vpop.f32.mrf.mxu0 }
 0x16e   : > { %v4875_v49 = vpop.f32.mrf.mxu1 }
 0x16f   : > { %6158 = vst [vmem:[#allocation6_spill] sm:$0xff] %v5896_v24  ;;  %v5899_v38 = vadd.f32 %v1941_v36, %v1630_v1  ;;  %v1635_v33 = vadd.f32 %v4875_v49, %v5806_v21  ;;  %v1954_v32 = vpop.f32.mrf.mxu0 }
 0x170   : > { %v1590_v63 = vpop.f32.mrf.mxu1 }
 0x171   : > { %6159 = vst [vmem:[#allocation7_spill] sm:$0xff] %v5899_v38  ;;  %v5902_v29 = vadd.f32 %v4909_v42, %v1635_v33  ;;  %v1633_v40 = vadd.f32 %v1590_v63, %v5809_v26  ;;  %v4910_v37 = vpop.f32.mrf.mxu0 }
 0x172   : > { %v4876_v18 = vpop.f32.mrf.mxu1 }
 0x173   : > { %v5905_v31 = vadd.f32 %v1954_v32, %v1633_v40  ;;  %v1636_v8 = vadd.f32 %v4876_v18, %v5812_v41  ;;  %v1957_v56 = vpop.f32.mrf.mxu0 }
 0x174   : > { %v1593_v19 = vpop.f32.mrf.mxu1 }
 0x175   : > { %6160 = vst [vmem:[#allocation8_spill] sm:$0xff] %v5905_v31  ;;  %v5908_v34 = vadd.f32 %v4910_v37, %v1636_v8  ;;  %v1634_v13 = vadd.f32 %v1593_v19, %v5815_v5  ;;  %v4949_v2 = vpop.f32.mrf.mxu0 }
 0x176   : > { %v4915_v21 = vpop.f32.mrf.mxu1 }
 0x177   : > { %6161 = vst [vmem:[#allocation9_spill] sm:$0xff] %v5908_v34  ;;  %v5911_v39 = vadd.f32 %v1957_v56, %v1634_v13  ;;  %v2335_v54 = vadd.f32 %v4915_v21, %v5818_v7  ;;  %v2570_v62 = vpop.f32.mrf.mxu0 }
 0x178   : > { %v2206_v26 = vpop.f32.mrf.mxu1 }
 0x179   : > { %6162 = vst [vmem:[#allocation10_spill] sm:$0xff] %v5911_v39  ;;  %v5914_v45 = vadd.f32 %v4949_v2, %v2335_v54  ;;  %v2333_v0 = vadd.f32 %v2206_v26, %v5821_v48  ;;  %v5917_v3 = vpop.f32.mrf.mxu0 }
 0x17a   : > { %v5919_v41 = vpop.f32.mrf.mxu1 }
 0x17b   : > { %v5921_v52 = vadd.f32 %v2570_v62, %v2333_v0  ;;  %v5923_v20 = vpop.f32.mrf.mxu0 }
 0x17c   : > { %v5925_v5 = vpop.f32.mrf.mxu1 }
 0x17d   : > { %v4953_v4 = vpop.f32.mrf.mxu0 }
 0x17e   : > { %v4919_v61 = vpop.f32.mrf.mxu1 }
 0x17f   : > { %v2339_v7 = vadd.f32 %v4919_v61, %v5830_v17  ;;  %v5928_v25 = vpop.f32.mrf.mxu0 }
 0x180   : > { %v5930_v43 = vpop.f32.mrf.mxu1 }
 0x181   : > { %v5932_v60 = vadd.f32 %v4953_v4, %v2339_v7  ;;  %v5934_v48 = vpop.f32.mrf.mxu0 }
 0x182   : > { %v5936_v36 = vpop.f32.mrf.mxu1 }
 0x183   : > { %v5938_v46 = vpop.f32.mrf.mxu0 }
 0x184   : > { %v5940_v1 = vpop.f32.mrf.mxu1 }
 0x185   : > { %v4957_v42 = vpop.f32.mrf.mxu0 }
 0x186   : > { %v4923_v49 = vpop.f32.mrf.mxu1 }
 0x187   : > { %v2343_v33 = vadd.f32 %v4923_v49, %v5842_v28  ;;  %v5943_v32 = vpop.f32.mrf.mxu0 }
 0x188   : > { %v5945_v17 = vpop.f32.mrf.mxu1 }
 0x189   : > { %v5947_v63 = vadd.f32 %v4957_v42, %v2343_v33  ;;  %v5949_v40 = vpop.f32.mrf.mxu0 }
 0x18a   : > { %v5951_v37 = vpop.f32.mrf.mxu1 }
 0x18b   : > { %v5953_v18 = vpop.f32.mrf.mxu0 }
 0x18c   : > { %v5955_v8 = vpop.f32.mrf.mxu1 }
 0x18d   : > { %v4961_v56 = vpop.f32.mrf.mxu0 }
 0x18e   : > { %v4927_v19 = vpop.f32.mrf.mxu1 }
 0x18f   : > { %v2347_v13 = vadd.f32 %v4927_v19, %v5854_v53  ;;  %v5958_v2 = vpop.f32.mrf.mxu0 }
 0x190   : > { %v5960_v28 = vpop.f32.mrf.mxu1 }
 0x191   : > { %v5962_v21 = vadd.f32 %v4961_v56, %v2347_v13  ;;  %v5964_v54 = vpop.f32.mrf.mxu0 }
 0x192   : > { %v5966_v62 = vpop.f32.mrf.mxu1 }
 0x193   : > { %v5968_v26 = vpop.f32.mrf.mxu0 }
 0x194   : > { %v5970_v0 = vpop.f32.mrf.mxu1 }
 0x195   : > { %v4965_v4 = vpop.f32.mrf.mxu0 }
 0x196   : > { %v4931_v61 = vpop.f32.mrf.mxu1 }
 0x197   : > { %v2351_v7 = vadd.f32 %v4931_v61, %v5866_v23  ;;  %v5973_v42 = vpop.f32.mrf.mxu0 }
 0x198   : > { %v5975_v53 = vpop.f32.mrf.mxu1 }
 0x199   : > { %v5977_v49 = vadd.f32 %v4965_v4, %v2351_v7  ;;  %v5979_v33 = vpop.f32.mrf.mxu0 }
 0x19a   : > { %v5981_v56 = vpop.f32.mrf.mxu1 }
 0x19b   : > { %v5983_v19 = vpop.f32.mrf.mxu0 }
 0x19c   : > { %v5985_v13 = vpop.f32.mrf.mxu1 }
 0x19d   : > { %v4969_v39 = vpop.f32.mrf.mxu0 }
 0x19e   : > { %v4935_v34 = vpop.f32.mrf.mxu1 }
 0x19f   : > { %v2355_v31 = vadd.f32 %v4935_v34, %v5878_v47  ;;  %v5988_v38 = vpop.f32.mrf.mxu0 }
 0x1a0   : > { %6163 = vst [vmem:[#allocation11_spill] sm:$0xff] %v5988_v38  ;;  %v5990_v23 = vpop.f32.mrf.mxu1 }
 0x1a1   : > { %6164 = vst [vmem:[#allocation12_spill] sm:$0xff] %v5990_v23  ;;  %v5992_v61 = vadd.f32 %v4969_v39, %v2355_v31  ;;  %v5994_v4 = vpop.f32.mrf.mxu0 }
 0x1a2   : > { %6166 = vst [vmem:[#allocation14_spill] sm:$0xff] %v5994_v4  ;;  %v5996_v7 = vpop.f32.mrf.mxu1 }
 0x1a3   : > { %6165 = vst [vmem:[#allocation13_spill] sm:$0xff] %v5992_v61  ;;  %6167 = vst [vmem:[#allocation15_spill] sm:$0xff] %v5996_v7  ;;  %v5998_v24 = vpop.f32.mrf.mxu0 }
 0x1a4   : > { %6168 = vst [vmem:[#allocation16_spill] sm:$0xff] %v5998_v24  ;;  %v6000_v14 = vpop.f32.mrf.mxu1 }
 0x1a5   : > { %6169 = vst [vmem:[#allocation17_spill] sm:$0xff] %v6000_v14  ;;  %v4973_v57 = vpop.f32.mrf.mxu0 }
 0x1a6   : > { %v4939_v55 = vpop.f32.mrf.mxu1 }
 0x1a7   : > { %v2359_v50 = vadd.f32 %v4939_v55, %v5890_v59  ;;  %v6003_v47 = vpop.f32.mrf.mxu0 }
 0x1a8   : > { %6170 = vst [vmem:[#allocation18_spill] sm:$0xff] %v6003_v47  ;;  %v6005_v34 = vpop.f32.mrf.mxu1 }
 0x1a9   : > { %v6007_v38 = vadd.f32 %v4973_v57, %v2359_v50  ;;  %v6009_v31 = vpop.f32.mrf.mxu0 }
 0x1aa   : > { %6172 = vst [vmem:[#allocation20_spill] sm:$0xff] %v6009_v31  ;;  %v6011_v39 = vpop.f32.mrf.mxu1  ;;  %v2336_v31 = vadd.f32 %v5919_v41, %v5824_v51  ;;  %v2337_v41 = vadd.f32 %v5930_v43, %v5833_v11 }
 0x1ab   : > { %6171 = vst [vmem:[#allocation19_spill] sm:$0xff] %v6007_v38  ;;  %v6013_v61 = vpop.f32.mrf.mxu0 }
 0x1ac   : > { %6173 = vst [vmem:[#allocation21_spill] sm:$0xff] %v6013_v61  ;;  %v6015_v24 = vpop.f32.mrf.mxu1 }
 0x1ad   : > { %6174 = vst [vmem:[#allocation22_spill] sm:$0xff] %v6015_v24  ;;  %v4977_v4 = vpop.f32.mrf.mxu0 }
 0x1ae   : > { %v4943_v14 = vpop.f32.mrf.mxu1 }
 0x1af   : > { %v2363_v7 = vadd.f32 %v4943_v14, %v5902_v29  ;;  %v6018_v23 = vpop.f32.mrf.mxu0 }
 0x1b0   : > { %6175 = vst [vmem:[#allocation23_spill] sm:$0xff] %v6018_v23  ;;  %v6020_v55 = vpop.f32.mrf.mxu1  ;;  %v2334_v23 = vadd.f32 %v5925_v5, %v5827_v16  ;;  %v2340_v16 = vadd.f32 %v5936_v36, %v5836_v22  ;;  %v2701_v22 = vadd.f32 %v5928_v25, %v2337_v41  ;;  %v2344_v41 = vadd.f32 %v5951_v37, %v5848_v10 }
 0x1b1   : > { %6176 = vst [vmem:[#allocation24_spill] sm:$0xff] %v6020_v55  ;;  %v6023_v59 = vadd.f32 %v4977_v4, %v2363_v7  ;;  %v6025_v50 = vpop.f32.mrf.mxu0  ;;  %v2700_v7 = vadd.f32 %v5917_v3, %v2336_v31 }
 0x1b2   : > { %6178 = vst [vmem:[#allocation26_spill] sm:$0xff] %v6025_v50  ;;  %v6027_v57 = vpop.f32.mrf.mxu1 }
 0x1b3   : > { %6177 = vst [vmem:[#allocation25_spill] sm:$0xff] %v6023_v59  ;;  %6179 = vst [vmem:[#allocation27_spill] sm:$0xff] %v6027_v57  ;;  %v6029_v38 = vpop.f32.mrf.mxu0 }
 0x1b4   : > { %6180 = vst [vmem:[#allocation28_spill] sm:$0xff] %v6029_v38  ;;  %v6031_v61 = vpop.f32.mrf.mxu1 }
 0x1b5   : > { %6181 = vst [vmem:[#allocation29_spill] sm:$0xff] %v6031_v61  ;;  %v5017_v14 = vpop.f32.mrf.mxu0  ;;  %v2698_v61 = vadd.f32 %v5923_v20, %v2334_v23 }
 0x1b6   : > { %v4983_v29 = vpop.f32.mrf.mxu1 }
 0x1b7   : > { %v3298_v55 = vpop.f32.mrf.mxu0  ;;  %v3063_v59 = vadd.f32 %v4983_v29, %v5914_v45 }
 0x1b8   : > { %v2934_v4 = vpop.f32.mrf.mxu1 }
 0x1b9   : > { %v3061_v38 = vadd.f32 %v2934_v4, %v5921_v52  ;;  %v5018_v50 = vpop.f32.mrf.mxu0  ;;  %v3427_v47 = vadd.f32 %v5017_v14, %v3063_v59  ;;  %v2338_v52 = vadd.f32 %v5940_v1, %v5839_v27 }
 0x1ba   : > { %v4984_v57 = vpop.f32.mrf.mxu1 }
 0x1bb   : > { %v3064_v24 = vadd.f32 %v4984_v57, %v2700_v7  ;;  %v3301_v51 = vpop.f32.mrf.mxu0  ;;  %v3425_v3 = vadd.f32 %v3298_v55, %v3061_v38  ;;  %v2341_v57 = vadd.f32 %v5945_v17, %v5845_v30  ;;  %v3657_v7 = vmul.f32 %v3427_v47, %v3427_v47 }
 0x1bc   : > { %v2937_v5 = vpop.f32.mrf.mxu1 }
 0x1bd   : > { %v3428_v31 = vadd.f32 %v5018_v50, %v3064_v24  ;;  %v3062_v45 = vadd.f32 %v2937_v5, %v2698_v61  ;;  %v5021_v29 = vpop.f32.mrf.mxu0  ;;  %v2704_v24 = vadd.f32 %v5934_v48, %v2340_v16  ;;  %v3655_v61 = vmul.f32 %v3425_v3, %v3425_v3 }
 0x1be   : > { %v4987_v20 = vpop.f32.mrf.mxu1  ;;  %v2702_v50 = vadd.f32 %v5938_v46, %v2338_v52 }
 0x1bf   : > { %v4501_v11 = vpack.c.bf16 %v3428_v31, %v3427_v47  ;;  %v3426_v43 = vadd.f32 %v3301_v51, %v3062_v45  ;;  %v3314_v23 = vpop.f32.mrf.mxu0  ;;  %v3067_v38 = vadd.f32 %v4987_v20, %v5932_v60  ;;  %v3658_v16 = vmul.f32 %v3428_v31, %v3428_v31 }
 0x1c0   : > { %v2950_v36 = vpop.f32.mrf.mxu1 }
 0x1c1   : > { %4573 = vst [vmem:[%s6050_s23 + $0x8] sm:$0xff] %v4501_v11   ;;  %v4496_v27 = vpack.c.bf16 %v3426_v43, %v3425_v3  ;;  %v3617_v1 = vadd.f32 %v3426_v43, %v3425_v3  ;;  %v3656_v55 = vmul.f32 %v3426_v43, %v3426_v43  ;;  %v5022_v59 = vpop.f32.mrf.mxu0  ;;  %v3065_v14 = vadd.f32 %v2950_v36, %v2701_v22 }
 0x1c2   : > { %v4988_v4 = vpop.f32.mrf.mxu1  ;;  %v3431_v5 = vadd.f32 %v5021_v29, %v3067_v38  ;;  %v2705_v11 = vadd.f32 %v5943_v32, %v2341_v57  ;;  %v2708_v38 = vadd.f32 %v5949_v40, %v2344_v41  ;;  %v2348_v57 = vadd.f32 %v5966_v62, %v5860_v9 }
 0x1c3   : > { %4497 = vst [vmem:[%s6050_s23] sm:$0xff] %v4496_v27   ;;  %v3618_v25 = vadd.f32 %v3617_v1, %v3427_v47  ;;  %v3687_v48 = vadd.f32 %v3656_v55, %v3655_v61  ;;  %v3068_v51 = vadd.f32 %v4988_v4, %v2704_v24  ;;  %v3317_v60 = vpop.f32.mrf.mxu0  ;;  %v3429_v3 = vadd.f32 %v3314_v23, %v3065_v14 }
 0x1c4   : > { %v2953_v45 = vpop.f32.mrf.mxu1  ;;  %v2342_v47 = vadd.f32 %v5955_v8, %v5851_v15  ;;  %v3661_v4 = vmul.f32 %v3431_v5, %v3431_v5  ;;  %v2346_v9 = vadd.f32 %v5970_v0, %v5863_v12 }
 0x1c5   : > { %v3688_v20 = vadd.f32 %v3687_v48, %v3657_v7  ;;  %v3619_v46 = vadd.f32 %v3618_v25, %v3428_v31  ;;  %v3432_v52 = vadd.f32 %v5022_v59, %v3068_v51  ;;  %v3066_v30 = vadd.f32 %v2953_v45, %v2702_v50  ;;  %v5025_v17 = vpop.f32.mrf.mxu0 }
 0x1c6   : > { %v4991_v43 = vpop.f32.mrf.mxu1  ;;  %v3659_v24 = vmul.f32 %v3429_v3, %v3429_v3  ;;  %v2706_v59 = vadd.f32 %v5953_v18, %v2342_v47  ;;  %v2345_v50 = vadd.f32 %v5960_v28, %v5857_v58  ;;  %v2710_v0 = vadd.f32 %v5968_v26, %v2346_v9 }
 0x1c7   : > { %v3620_v22 = vadd.f32 %v3619_v46, %v3429_v3  ;;  %v3689_v36 = vadd.f32 %v3688_v20, %v3658_v16  ;;  %v4511_v10 = vpack.c.bf16 %v3432_v52, %v3431_v5  ;;  %v3330_v37 = vpop.f32.mrf.mxu0  ;;  %v3430_v29 = vadd.f32 %v3317_v60, %v3066_v30 }
 0x1c8   : > { %v2966_v23 = vpop.f32.mrf.mxu1  ;;  %v3071_v61 = vadd.f32 %v4991_v43, %v5947_v63  ;;  %v3662_v18 = vmul.f32 %v3432_v52, %v3432_v52  ;;  %v2709_v28 = vadd.f32 %v5958_v2, %v2345_v50  ;;  %v2712_v46 = vadd.f32 %v5964_v54, %v2348_v57 }
 0x1c9   : > { %v3690_v31 = vadd.f32 %v3689_v36, %v3659_v24  ;;  %4575 = vst [vmem:[%s6050_s23 + $0x18] sm:$0xff] %v4511_v10   ;;  %v3069_v27 = vadd.f32 %v2966_v23, %v2705_v11  ;;  %v5026_v32 = vpop.f32.mrf.mxu0  ;;  %v4506_v1 = vpack.c.bf16 %v3430_v29, %v3429_v3  ;;  %v3621_v55 = vadd.f32 %v3620_v22, %v3430_v29 }
 0x1ca   : > { %v3660_v15 = vmul.f32 %v3430_v29, %v3430_v29  ;;  %v4992_v8 = vpop.f32.mrf.mxu1  ;;  %v3435_v51 = vadd.f32 %v5025_v17, %v3071_v61  ;;  %v2349_v54 = vadd.f32 %v5975_v53, %v5869_v35 }
 0x1cb   : > { %v3072_v40 = vadd.f32 %v4992_v8, %v2708_v38  ;;  %v3333_v14 = vpop.f32.mrf.mxu0  ;;  %4574 = vst [vmem:[%s6050_s23 + $0x10] sm:$0xff] %v4506_v1   ;;  %v3622_v7 = vadd.f32 %v3621_v55, %v3431_v5  ;;  %v3433_v25 = vadd.f32 %v3330_v37, %v3069_v27  ;;  %v2352_v37 = vadd.f32 %v5981_v56, %v5872_v6 }
 0x1cc   : > { %v3691_v63 = vadd.f32 %v3690_v31, %v3660_v15  ;;  %v2969_v48 = vpop.f32.mrf.mxu1  ;;  %v3665_v38 = vmul.f32 %v3435_v51, %v3435_v51  ;;  %v2713_v53 = vadd.f32 %v5973_v42, %v2349_v54  ;;  %v2350_v6 = vadd.f32 %v5985_v13, %v5875_v44 }
 0x1cd   : > { %v3436_v60 = vadd.f32 %v5026_v32, %v3072_v40  ;;  %v3070_v41 = vadd.f32 %v2969_v48, %v2706_v59  ;;  %v5029_v16 = vpop.f32.mrf.mxu0  ;;  %v3623_v45 = vadd.f32 %v3622_v7, %v3432_v52  ;;  %v3663_v17 = vmul.f32 %v3433_v25, %v3433_v25 }
 0x1ce   : > { %v3692_v3 = vadd.f32 %v3691_v63, %v3661_v4  ;;  %v4995_v58 = vpop.f32.mrf.mxu1  ;;  %v2716_v40 = vadd.f32 %v5979_v33, %v2352_v37  ;;  %v2714_v13 = vadd.f32 %v5983_v19, %v2350_v6  ;;  %v6191_v6 = vld [vmem:[#allocation16_spill] sm:$0xff] }
 0x1cf   : > { %v4521_v62 = vpack.c.bf16 %v3436_v60, %v3435_v51  ;;  %v3434_v20 = vadd.f32 %v3333_v14, %v3070_v41  ;;  %v3346_v5 = vpop.f32.mrf.mxu0  ;;  %v3624_v30 = vadd.f32 %v3623_v45, %v3433_v25  ;;  %v3075_v52 = vadd.f32 %v4995_v58, %v5962_v21  ;;  %v6184_v45 = vld [vmem:[#allocation3_spill] sm:$0xff] }
 0x1d0   : > { %v3693_v11 = vadd.f32 %v3692_v3, %v3662_v18  ;;  %v2982_v47 = vpop.f32.mrf.mxu1  ;;  %v3666_v26 = vmul.f32 %v3436_v60, %v3436_v60  ;;  %v6182_v18 = vld [vmem:[#allocation2_spill] sm:$0xff]  ;;  %v6183_v3 = vld [vmem:[#allocation12_spill] sm:$0xff]  ;;  %v6185_v58 = vld [vmem:[#allocation15_spill] sm:$0xff] }
 0x1d1   : > { %4577 = vst [vmem:[%s6050_s23 + $0x28] sm:$0xff] %v4521_v62   ;;  %v4516_v43 = vpack.c.bf16 %v3434_v20, %v3433_v25  ;;  %v3664_v22 = vmul.f32 %v3434_v20, %v3434_v20  ;;  %v3073_v24 = vadd.f32 %v2982_v47, %v2709_v28  ;;  %v5030_v2 = vpop.f32.mrf.mxu0  ;;  %v3625_v10 = vadd.f32 %v3624_v30, %v3434_v20 }
 0x1d2   : > { %v3694_v36 = vadd.f32 %v3693_v11, %v3663_v17  ;;  %v4996_v12 = vpop.f32.mrf.mxu1  ;;  %v3439_v32 = vadd.f32 %v5029_v16, %v3075_v52  ;;  %v2353_v33 = vadd.f32 %v6183_v3, %v6182_v18  ;;  %v2356_v28 = vadd.f32 %v6185_v58, %v6184_v45  ;;  %v6196_v58 = vld [vmem:[#allocation22_spill] sm:$0xff] }
 0x1d3   : > { %4576 = vst [vmem:[%s6050_s23 + $0x20] sm:$0xff] %v4516_v43   ;;  %v3076_v29 = vadd.f32 %v4996_v12, %v2712_v46  ;;  %v3349_v23 = vpop.f32.mrf.mxu0  ;;  %v3626_v31 = vadd.f32 %v3625_v10, %v3435_v51  ;;  %v3437_v21 = vadd.f32 %v3346_v5, %v3073_v24  ;;  %v6187_v10 = vld [vmem:[#allocation4_spill] sm:$0xff]  ;;  %v6188_v12 = vld [vmem:[#allocation17_spill] sm:$0xff] }
 0x1d4   : > { %v3695_v61 = vadd.f32 %v3694_v36, %v3664_v22  ;;  %v2985_v27 = vpop.f32.mrf.mxu1  ;;  %v3669_v20 = vmul.f32 %v3439_v32, %v3439_v32 }
 0x1d5   : > { %v3440_v1 = vadd.f32 %v5030_v2, %v3076_v29  ;;  %v3074_v55 = vadd.f32 %v2985_v27, %v2710_v0  ;;  %v5033_v15 = vpop.f32.mrf.mxu0  ;;  %v3627_v59 = vadd.f32 %v3626_v31, %v3436_v60  ;;  %v3667_v4 = vmul.f32 %v3437_v21, %v3437_v21  ;;  %v6186_v2 = vld [vmem:[#allocation11_spill] sm:$0xff] }
 0x1d6   : > { %v3696_v8 = vadd.f32 %v3695_v61, %v3665_v38  ;;  %v4999_v35 = vpop.f32.mrf.mxu1  ;;  %v2717_v36 = vadd.f32 %v6186_v2, %v2353_v33  ;;  %v2354_v0 = vadd.f32 %v6188_v12, %v6187_v10  ;;  %v6194_v33 = vld [vmem:[#allocation18_spill] sm:$0xff]  ;;  %v6199_v12 = vld [vmem:[#allocation21_spill] sm:$0xff] }
 0x1d7   : > { %v4531_v56 = vpack.c.bf16 %v3440_v1, %v3439_v32  ;;  %v3438_v50 = vadd.f32 %v3349_v23, %v3074_v55  ;;  %v3362_v57 = vpop.f32.mrf.mxu0  ;;  %v3628_v14 = vadd.f32 %v3627_v59, %v3437_v21  ;;  %v3079_v51 = vadd.f32 %v4999_v35, %v5977_v49  ;;  %v6189_v23 = vld [vmem:[#allocation14_spill] sm:$0xff] }
 0x1d8   : > { %v3697_v7 = vadd.f32 %v3696_v8, %v3666_v26  ;;  %v2998_v63 = vpop.f32.mrf.mxu1  ;;  %v3670_v19 = vmul.f32 %v3440_v1, %v3440_v1  ;;  %v2720_v38 = vadd.f32 %v6189_v23, %v2356_v28  ;;  %v6202_v23 = vld [vmem:[#allocation9_spill] sm:$0xff] }
 0x1d9   : > { %4579 = vst [vmem:[%s6050_s23 + $0x38] sm:$0xff] %v4531_v56   ;;  %v4526_v25 = vpack.c.bf16 %v3438_v50, %v3437_v21  ;;  %v3668_v48 = vmul.f32 %v3438_v50, %v3438_v50  ;;  %v3077_v60 = vadd.f32 %v2998_v63, %v2713_v53  ;;  %v5034_v42 = vpop.f32.mrf.mxu0  ;;  %v3629_v16 = vadd.f32 %v3628_v14, %v3438_v50  ;;  %v6192_v50 = vld [vmem:[#allocation5_spill] sm:$0xff] }
 0x1da   : > { %v3698_v41 = vadd.f32 %v3697_v7, %v3667_v4  ;;  %v5000_v44 = vpop.f32.mrf.mxu1  ;;  %v3443_v17 = vadd.f32 %v5033_v15, %v3079_v51  ;;  %v2718_v56 = vadd.f32 %v6191_v6, %v2354_v0 }
 0x1db   : > { %4578 = vst [vmem:[%s6050_s23 + $0x30] sm:$0xff] %v4526_v25   ;;  %v3080_v9 = vadd.f32 %v5000_v44, %v2716_v40  ;;  %v3365_v62 = vpop.f32.mrf.mxu0  ;;  %v3630_v5 = vadd.f32 %v3629_v16, %v3439_v32  ;;  %v3441_v49 = vadd.f32 %v3362_v57, %v3077_v60  ;;  %v2357_v57 = vadd.f32 %v6005_v34, %v6192_v50  ;;  %v6193_v40 = vld [vmem:[#allocation6_spill] sm:$0xff] }
 0x1dc   : > { %v3699_v46 = vadd.f32 %v3698_v41, %v3668_v48  ;;  %v3001_v30 = vpop.f32.mrf.mxu1  ;;  %v2360_v14 = vadd.f32 %v6011_v39, %v6193_v40  ;;  %v3673_v63 = vmul.f32 %v3443_v17, %v3443_v17  ;;  %v6195_v39 = vld [vmem:[#allocation7_spill] sm:$0xff] }
 0x1dd   : > { %v3444_v11 = vadd.f32 %v5034_v42, %v3080_v9  ;;  %v3078_v47 = vadd.f32 %v3001_v30, %v2714_v13  ;;  %v5037_v43 = vpop.f32.mrf.mxu0  ;;  %v3631_v52 = vadd.f32 %v3630_v5, %v3440_v1  ;;  %v3671_v61 = vmul.f32 %v3441_v49, %v3441_v49  ;;  %v6190_v1 = vld [vmem:[#allocation13_spill] sm:$0xff]  ;;  %v6197_v5 = vld [vmem:[#allocation20_spill] sm:$0xff] }
 0x1de   : > { %v3700_v22 = vadd.f32 %v3699_v46, %v3669_v20  ;;  %v5003_v24 = vpop.f32.mrf.mxu1  ;;  %v2721_v45 = vadd.f32 %v6194_v33, %v2357_v57  ;;  %v2358_v28 = vadd.f32 %v6196_v58, %v6195_v39  ;;  %v2724_v46 = vadd.f32 %v6197_v5, %v2360_v14  ;;  %v6204_v57 = vld [vmem:[#allocation23_spill] sm:$0xff]  ;;  %v6205_v14 = vld [vmem:[#allocation10_spill] sm:$0xff] }
 0x1df   : > { %v4541_v54 = vpack.c.bf16 %v3444_v11, %v3443_v17  ;;  %v3442_v37 = vadd.f32 %v3365_v62, %v3078_v47  ;;  %v3378_v29 = vpop.f32.mrf.mxu0  ;;  %v3632_v31 = vadd.f32 %v3631_v52, %v3441_v49  ;;  %v3083_v15 = vadd.f32 %v5003_v24, %v6190_v1 }
 0x1e0   : > { %v3701_v21 = vadd.f32 %v3700_v22, %v3670_v19  ;;  %v3014_v27 = vpop.f32.mrf.mxu1  ;;  %v3674_v13 = vmul.f32 %v3444_v11, %v3444_v11  ;;  %v2722_v0 = vadd.f32 %v6199_v12, %v2358_v28 }
 0x1e1   : > { %4581 = vst [vmem:[%s6050_s23 + $0x48] sm:$0xff] %v4541_v54   ;;  %v4536_v32 = vpack.c.bf16 %v3442_v37, %v3441_v49  ;;  %v3672_v55 = vmul.f32 %v3442_v37, %v3442_v37  ;;  %v3081_v26 = vadd.f32 %v3014_v27, %v2717_v36  ;;  %v5038_v8 = vpop.f32.mrf.mxu0  ;;  %v3633_v35 = vadd.f32 %v3632_v31, %v3442_v37  ;;  %v6200_v54 = vld [vmem:[#allocation8_spill] sm:$0xff] }
 0x1e2   : > { %v3702_v59 = vadd.f32 %v3701_v21, %v3671_v61  ;;  %v5004_v53 = vpop.f32.mrf.mxu1  ;;  %v3447_v42 = vadd.f32 %v5037_v43, %v3083_v15  ;;  %v6201_v37 = vld [vmem:[#allocation24_spill] sm:$0xff] }
 0x1e3   : > { %4580 = vst [vmem:[%s6050_s23 + $0x40] sm:$0xff] %v4536_v32   ;;  %v3084_v4 = vadd.f32 %v5004_v53, %v2720_v38  ;;  %v3381_v7 = vpop.f32.mrf.mxu0  ;;  %v3634_v25 = vadd.f32 %v3633_v35, %v3443_v17  ;;  %v3445_v51 = vadd.f32 %v3378_v29, %v3081_v26  ;;  %v2361_v29 = vadd.f32 %v6201_v37, %v6200_v54  ;;  %v6203_v38 = vld [vmem:[#allocation27_spill] sm:$0xff] }
 0x1e4   : > { %v3703_v48 = vadd.f32 %v3702_v59, %v3672_v55  ;;  %v3017_v60 = vpop.f32.mrf.mxu1  ;;  %v2364_v31 = vadd.f32 %v6203_v38, %v6202_v23  ;;  %v3677_v27 = vmul.f32 %v3447_v42, %v3447_v42 }
 0x1e5   : > { %v3448_v41 = vadd.f32 %v5038_v8, %v3084_v4  ;;  %v3082_v16 = vadd.f32 %v3017_v60, %v2718_v56  ;;  %v5041_v44 = vpop.f32.mrf.mxu0  ;;  %v3635_v3 = vadd.f32 %v3634_v25, %v3444_v11  ;;  %v3675_v30 = vmul.f32 %v3445_v51, %v3445_v51  ;;  %v6198_v11 = vld [vmem:[#allocation19_spill] sm:$0xff]  ;;  %v6206_v4 = vld [vmem:[#allocation29_spill] sm:$0xff] }
 0x1e6   : > { %v3704_v18 = vadd.f32 %v3703_v48, %v3673_v63  ;;  %v5007_v34 = vpop.f32.mrf.mxu1  ;;  %v2725_v40 = vadd.f32 %v6204_v57, %v2361_v29 }
 0x1e7   : > { %v4551_v9 = vpack.c.bf16 %v3448_v41, %v3447_v42  ;;  %v3446_v62 = vadd.f32 %v3381_v7, %v3082_v16  ;;  %v3394_v20 = vpop.f32.mrf.mxu0  ;;  %v3636_v49 = vadd.f32 %v3635_v3, %v3445_v51  ;;  %v3087_v22 = vadd.f32 %v5007_v34, %v6198_v11 }
 0x1e8   : > { %v3705_v17 = vadd.f32 %v3704_v18, %v3674_v13  ;;  %v3030_v47 = vpop.f32.mrf.mxu1  ;;  %v3678_v53 = vmul.f32 %v3448_v41, %v3448_v41  ;;  %v2362_v7 = vadd.f32 %v6206_v4, %v6205_v14 }
 0x1e9   : > { %4583 = vst [vmem:[%s6050_s23 + $0x58] sm:$0xff] %v4551_v9   ;;  %v4546_v43 = vpack.c.bf16 %v3446_v62, %v3445_v51  ;;  %v3676_v19 = vmul.f32 %v3446_v62, %v3446_v62  ;;  %v3085_v52 = vadd.f32 %v3030_v47, %v2721_v45  ;;  %v5042_v24 = vpop.f32.mrf.mxu0  ;;  %v3637_v36 = vadd.f32 %v3636_v49, %v3446_v62  ;;  %v6207_v51 = vld [vmem:[#allocation26_spill] sm:$0xff]  ;;  %v6209_v9 = vld [vmem:[#allocation28_spill] sm:$0xff] }
 0x1ea   : > { %v3706_v2 = vadd.f32 %v3705_v17, %v3675_v30  ;;  %v5008_v10 = vpop.f32.mrf.mxu1  ;;  %v3451_v26 = vadd.f32 %v5041_v44, %v3087_v22  ;;  %v2728_v60 = vadd.f32 %v6207_v51, %v2364_v31  ;;  %v2726_v62 = vadd.f32 %v6209_v9, %v2362_v7 }
 0x1eb   : > { %4582 = vst [vmem:[%s6050_s23 + $0x50] sm:$0xff] %v4546_v43   ;;  %v3088_v61 = vadd.f32 %v5008_v10, %v2724_v46  ;;  %v3397_v21 = vpop.f32.mrf.mxu0  ;;  %v3638_v32 = vadd.f32 %v3637_v36, %v3447_v42  ;;  %v3449_v1 = vadd.f32 %v3394_v20, %v3085_v52 }
 0x1ec   : > { %v3707_v55 = vadd.f32 %v3706_v2, %v3676_v19  ;;  %v3033_v15 = vpop.f32.mrf.mxu1  ;;  %v3681_v5 = vmul.f32 %v3451_v26, %v3451_v26 }
 0x1ed   : > { %v3452_v8 = vadd.f32 %v5042_v24, %v3088_v61  ;;  %v3086_v59 = vadd.f32 %v3033_v15, %v2722_v0  ;;  %v5045_v35 = vpop.f32.mrf.mxu0  ;;  %v3639_v56 = vadd.f32 %v3638_v32, %v3448_v41  ;;  %v3679_v16 = vmul.f32 %v3449_v1, %v3449_v1  ;;  %v6208_v41 = vld [vmem:[#allocation25_spill] sm:$0xff] }
 0x1ee   : > { %v3708_v6 = vadd.f32 %v3707_v55, %v3677_v27  ;;  %v5011_v50 = vpop.f32.mrf.mxu1 }
 0x1ef   : > { %v4561_v63 = vpack.c.bf16 %v3452_v8, %v3451_v26  ;;  %v3450_v25 = vadd.f32 %v3397_v21, %v3086_v59  ;;  %v3410_v48 = vpop.f32.mrf.mxu0  ;;  %v3640_v42 = vadd.f32 %v3639_v56, %v3449_v1  ;;  %v3091_v34 = vadd.f32 %v5011_v50, %v6208_v41 }
 0x1f0   : > { %v3709_v44 = vadd.f32 %v3708_v6, %v3678_v53  ;;  %v3046_v13 = vpop.f32.mrf.mxu1  ;;  %v3682_v11 = vmul.f32 %v3452_v8, %v3452_v8 }
 0x1f1   : > { %4585 = vst [vmem:[%s6050_s23 + $0x68] sm:$0xff] %v4561_v63   ;;  %v4556_v18 = vpack.c.bf16 %v3450_v25, %v3449_v1  ;;  %v3680_v3 = vmul.f32 %v3450_v25, %v3450_v25  ;;  %v3089_v33 = vadd.f32 %v3046_v13, %v2725_v40  ;;  %v3641_v39 = vadd.f32 %v3640_v42, %v3450_v25  ;;  %v5046_v28 = vpop.f32.mrf.mxu0 }
 0x1f2   : > { %v3710_v45 = vadd.f32 %v3709_v44, %v3679_v16  ;;  %v5012_v58 = vpop.f32.mrf.mxu1  ;;  %v3455_v47 = vadd.f32 %v5045_v35, %v3091_v34 }
 0x1f3   : > { %4584 = vst [vmem:[%s6050_s23 + $0x60] sm:$0xff] %v4556_v18   ;;  %v3092_v20 = vadd.f32 %v5012_v58, %v2728_v60  ;;  %v3642_v46 = vadd.f32 %v3641_v39, %v3451_v26  ;;  %v3453_v30 = vadd.f32 %v3410_v48, %v3089_v33  ;;  %v3413_v24 = vpop.f32.mrf.mxu0 }
 0x1f4   : > { %v3711_v49 = vadd.f32 %v3710_v45, %v3680_v3  ;;  %v3049_v17 = vpop.f32.mrf.mxu1  ;;  %v3685_v38 = vmul.f32 %v3455_v47, %v3455_v47 }
 0x1f5   : > { %v3456_v43 = vadd.f32 %v5046_v28, %v3092_v20  ;;  %v3090_v19 = vadd.f32 %v3049_v17, %v2726_v62  ;;  %v3643_v52 = vadd.f32 %v3642_v46, %v3452_v8  ;;  %v3683_v12 = vmul.f32 %v3453_v30, %v3453_v30 }
 0x1f6   : > { %v3712_v22 = vadd.f32 %v3711_v49, %v3681_v5 }
 0x1f7   : > { %v4571_v2 = vpack.c.bf16 %v3456_v43, %v3455_v47  ;;  %v3454_v36 = vadd.f32 %v3413_v24, %v3090_v19  ;;  %v3644_v10 = vadd.f32 %v3643_v52, %v3453_v30  ;;  %v3686_v21 = vmul.f32 %v3456_v43, %v3456_v43 }
 0x1f8   : > { %v3713_v0 = vadd.f32 %v3712_v22, %v3682_v11 }
 0x1f9   : > { %4587 = vst [vmem:[%s6050_s23 + $0x78] sm:$0xff] %v4571_v2   ;;  %v4566_v54 = vpack.c.bf16 %v3454_v36, %v3453_v30  ;;  %v3684_v37 = vmul.f32 %v3454_v36, %v3454_v36  ;;  %v3645_v23 = vadd.f32 %v3644_v10, %v3454_v36 }
 0x1fa   : > { %v3714_v29 = vadd.f32 %v3713_v0, %v3683_v12 }
 0x1fb   : > { %4586 = vst [vmem:[%s6050_s23 + $0x70] sm:$0xff] %v4566_v54   ;;  %v3646_v31 = vadd.f32 %v3645_v23, %v3455_v47 }
 0x1fc   : > { %v3715_v61 = vadd.f32 %v3714_v29, %v3684_v37 }
 0x1fd   : > { %v3647_v27 = vadd.f32 %v3646_v31, %v3456_v43 }
 0x1fe   : > { %v3716_v32 = vadd.f32 %v3715_v61, %v3685_v38 }
 0x1ff   : > { %v3648_v55 = vrot.slane %v3647_v27, 4 }
 0x200   : > { %v3717_v1 = vadd.f32 %v3716_v32, %v3686_v21 }
 0x201   : > { %v3649_v15 = vadd.f32 %v3648_v55, %v3647_v27 }
 0x202   : > { %v3718_v26 = vrot.slane %v3717_v1, 4 }
 0x203   : > { %v3650_v8 = vrot.slane %v3649_v15, 2 }
 0x204   : > { %v3719_v59 = vadd.f32 %v3718_v26, %v3717_v1 }
 0x205   : > { %v3651_v35 = vadd.f32 %v3650_v8, %v3649_v15 }
 0x206   : > { %v3720_v53 = vrot.slane %v3719_v59, 2 }
 0x207   : > { %v3652_v6 = vrot.slane %v3651_v35, 1 }
 0x208   : > { %v3721_v56 = vadd.f32 %v3720_v53, %v3719_v59 }
 0x209   : > { %v3653_v50 = vadd.f32 %v3652_v6, %v3651_v35 }
 0x20a   : > { %v3722_v57 = vrot.slane %v3721_v56, 1 }
 0x20b   : > { %3654 = vst [vmem:[%s236_s27] sm:$0x1] %v3653_v50 }
 0x20c   : > { %v3723_v40 = vadd.f32 %v3722_v57, %v3721_v56 }
 0x20e   : > { %3724 = vst [vmem:[%s241_s30] sm:$0x1] %v3723_v40 }
 0x20f PF: > { %s15_s17 = sadd.s32 1, %s5250_s17   ;;  %s6210_s15 = smov %s5246_s16 }
 0x210   : > { %p12_p6 = scmp.ge.s32.totalorder %s15_s17, 4   ;;  %s6211_s16 = smov %s6213_s18 }
 0x212   :  { %14 = sbr.rel (!%p12_p6) target bundleno = 2 (0x2), region = 99 }

</bundles_post_ra>
